<compile_context>
chip_gen: v7x
topology: tpu7x:2x2x1
jax: 0.10.0
libtpu: 0.0.40
codegen_flags: <defaults>
</compile_context>

<pallas_src>
import functools

import jax
import jax.numpy as jnp
from jax import lax
from jax.experimental import pallas as pl
from jax.experimental.pallas import tpu as pltpu


_LANE = 128
_VMEM_LIMIT = 32 * 1024 * 1024  # > v5e's 16 MiB default, fits v7x's 64 MiB


def _round_up(x, m):
    return (x + m - 1) // m * m


# ----------------------------------------------------------------------------
# Kernel A: tiled im2col matmul  (patches @ W + b, optional fused LeakyReLU)
# ----------------------------------------------------------------------------
def _conv_matmul_kernel(x_ref, w_ref, b_ref, o_ref, *, negative_slope):
    y = jnp.dot(x_ref[...], w_ref[...], preferred_element_type=jnp.float32)
    y = y + b_ref[...]
    if negative_slope is not None:
        y = jnp.where(y > 0, y, negative_slope * y)
    o_ref[...] = y.astype(o_ref.dtype)


def conv_matmul(patches2d, w2d, b, *, negative_slope=None, tile_m=512):
    """patches2d: (M, K), w2d: (K, Cout), b: (Cout,) -> (M, Cout) f32."""
    M, K = patches2d.shape
    Cout = w2d.shape[1]
    Cp = _round_up(Cout, _LANE)                 # lane-dense output stores

    # Pick a tile so the parallel grid has >= 2 steps whenever possible
    # (pipelining + megacore sharding), while keeping blocks well under VMEM.
    tile_m = min(tile_m, max(8, _round_up((M + 1) // 2, 8)))
    Mp = _round_up(M, tile_m)

    xp = patches2d.astype(jnp.bfloat16)         # bf16 MXU inputs, f32 accum
    if Mp != M:
        xp = jnp.pad(xp, ((0, Mp - M), (0, 0)))
    wp = w2d.astype(jnp.bfloat16)
    bp = b.reshape(1, Cout).astype(jnp.float32)
    if Cp != Cout:
        wp = jnp.pad(wp, ((0, 0), (0, Cp - Cout)))
        bp = jnp.pad(bp, ((0, 0), (0, Cp - Cout)))

    out = pl.pallas_call(
        functools.partial(_conv_matmul_kernel, negative_slope=negative_slope),
        out_shape=jax.ShapeDtypeStruct((Mp, Cp), jnp.float32),
        grid=(Mp // tile_m,),
        in_specs=[
            pl.BlockSpec((tile_m, K), lambda i: (i, 0)),
            pl.BlockSpec((K, Cp), lambda i: (0, 0)),     # weights resident
            pl.BlockSpec((1, Cp), lambda i: (0, 0)),     # bias resident
        ],
        out_specs=pl.BlockSpec((tile_m, Cp), lambda i: (i, 0)),
        compiler_params=pltpu.CompilerParams(
            dimension_semantics=("parallel",),
            vmem_limit_bytes=_VMEM_LIMIT),
    )(xp, wp, bp)
    return out[:M, :Cout]


# ----------------------------------------------------------------------------
# Kernel B: conv + InstanceNorm2d (affine=False) + LeakyReLU, fused, per-batch
# ----------------------------------------------------------------------------
def _conv_in_leaky_kernel(x_ref, w_ref, b_ref, o_ref, *, eps, negative_slope,
                          inv_hw):
    # One batch element: (HW, K) @ (K, Cp) -> (HW, Cp), resident in VMEM.
    y = jnp.dot(x_ref[0], w_ref[...], preferred_element_type=jnp.float32)
    y = y + b_ref[...]
    # Single-pass moments over the spatial axis (per channel), biased variance.
    s1 = jnp.sum(y, axis=0, keepdims=True)
    s2 = jnp.sum(y * y, axis=0, keepdims=True)
    mean = s1 * inv_hw
    var = jnp.maximum(s2 * inv_hw - mean * mean, 0.0)
    yn = (y - mean) * lax.rsqrt(var + eps)
    o_ref[0] = jnp.where(yn > 0, yn, negative_slope * yn).astype(o_ref.dtype)


def conv_inorm_leaky(patches3, w2d, b, *, eps=1e-5, negative_slope=0.2):
    """patches3: (N, HW, K), w2d: (K, Cout), b: (Cout,) -> (N, HW, Cout) f32."""
    N, HW, K = patches3.shape
    Cout = w2d.shape[1]
    Cp = _round_up(Cout, _LANE)

    xp = patches3.astype(jnp.bfloat16)
    wp = w2d.astype(jnp.bfloat16)
    bp = b.reshape(1, Cout).astype(jnp.float32)
    if Cp != Cout:
        wp = jnp.pad(wp, ((0, 0), (0, Cp - Cout)))
        bp = jnp.pad(bp, ((0, 0), (0, Cp - Cout)))

    out = pl.pallas_call(
        functools.partial(_conv_in_leaky_kernel, eps=eps,
                          negative_slope=negative_slope, inv_hw=1.0 / HW),
        out_shape=jax.ShapeDtypeStruct((N, HW, Cp), jnp.float32),
        grid=(N,),
        in_specs=[
            pl.BlockSpec((1, HW, K), lambda n: (n, 0, 0)),
            pl.BlockSpec((K, Cp), lambda n: (0, 0)),
            pl.BlockSpec((1, Cp), lambda n: (0, 0)),
        ],
        out_specs=pl.BlockSpec((1, HW, Cp), lambda n: (n, 0, 0)),
        compiler_params=pltpu.CompilerParams(
            dimension_semantics=("parallel",),
            vmem_limit_bytes=_VMEM_LIMIT),
    )(xp, wp, bp)
    return out[:, :, :Cout]


# ----------------------------------------------------------------------------
# JAX glue: padding + im2col patch extraction (tap order = (kh, kw, Cin))
# ----------------------------------------------------------------------------
def _extract_patches(xp, kh, kw, stride):
    """xp: padded NHWC input -> (N, OH, OW, kh*kw*C)."""
    N, H, W, C = xp.shape
    OH = (H - kh) // stride + 1
    OW = (W - kw) // stride + 1
    taps = []
    for i in range(kh):
        for j in range(kw):
            taps.append(xp[:, i:i + stride * OH:stride,
                           j:j + stride * OW:stride, :])
    return jnp.concatenate(taps, axis=-1), OH, OW


def conv_block(x, w, b, stride, *, fuse_leaky, use_inorm):
    """x: NHWC, w: (4,4,Cin,Cout) (HWIO), b: (Cout,)."""
    xp = jnp.pad(x, ((0, 0), (1, 1), (1, 1), (0, 0)))
    patches, OH, OW = _extract_patches(xp, 4, 4, stride)
    N = patches.shape[0]
    K = patches.shape[-1]
    Cout = w.shape[-1]
    w2d = w.reshape(K, Cout)
    if use_inorm:
        y = conv_inorm_leaky(patches.reshape(N, OH * OW, K), w2d, b)
    else:
        y = conv_matmul(patches.reshape(N * OH * OW, K), w2d, b,
                        negative_slope=0.2 if fuse_leaky else None)
    return y.reshape(N, OH, OW, Cout)


# ----------------------------------------------------------------------------
# Model assembly (PatchDiscriminator / Discriminator)
# ----------------------------------------------------------------------------
_STRIDES = (2, 2, 2, 1, 1)


def init_patch_discriminator(key, input_ch=3, output_ch=1, n_df=8):
    in_ch = input_ch + output_ch
    chans = [in_ch, n_df, 2 * n_df, 4 * n_df, 8 * n_df, 1]
    params = []
    for i in range(5):
        key, kw_, kb_ = jax.random.split(key, 3)
        w = 0.05 * jax.random.normal(kw_, (4, 4, chans[i], chans[i + 1]),
                                     jnp.float32)
        b = 0.05 * jax.random.normal(kb_, (chans[i + 1],), jnp.float32)
        params.append((w, b))
    return params


def patch_discriminator_forward(params, x_nhwc):
    """Returns result[1:] — all 5 block outputs, NHWC."""
    outs = []
    h = x_nhwc
    for i, (w, b) in enumerate(params):
        h = conv_block(h, w, b, _STRIDES[i],
                       fuse_leaky=(i == 0),          # block 0: conv + LeakyReLU
                       use_inorm=(i in (1, 2, 3)))   # blocks 1-3: +IN + LeakyReLU
        outs.append(h)                               # block 4: conv only
    return outs


def avg_pool_3x3_s2(x_nhwc):
    """AvgPool2d(k=3, p=1, s=2, count_include_pad=False) — only used if n_D>1."""
    pads = [(0, 0), (1, 1), (1, 1), (0, 0)]
    s = lax.reduce_window(x_nhwc, 0.0, lax.add, (1, 3, 3, 1), (1, 2, 2, 1), pads)
    c = lax.reduce_window(jnp.ones_like(x_nhwc[..., :1]), 0.0, lax.add,
                          (1, 3, 3, 1), (1, 2, 2, 1), pads)
    return s / c


def discriminator_forward(all_params, x_nchw, *, n_D=1):
    """NCHW in / NCHW outs, matching the PyTorch module. Compute is NHWC."""
    result = []
    x = jnp.transpose(x_nchw, (0, 2, 3, 1))
    for i in range(n_D):
        outs = patch_discriminator_forward(all_params[i], x)
        result.append([jnp.transpose(o, (0, 3, 1, 2)) for o in outs])
        if i != n_D - 1:
            x = avg_pool_3x3_s2(x)
    return result


# ----------------------------------------------------------------------------
# Pure-JAX reference (lax conv with matching bf16 matmul numerics)
# ----------------------------------------------------------------------------
def reference_patch_forward(params, x_nhwc):
    outs = []
    h = x_nhwc
    for i, (w, b) in enumerate(params):
        y = lax.conv_general_dilated(
            h.astype(jnp.bfloat16), w.astype(jnp.bfloat16),
            (_STRIDES[i], _STRIDES[i]), [(1, 1), (1, 1)],
            dimension_numbers=("NHWC", "HWIO", "NHWC"),
            preferred_element_type=jnp.float32) + b
        if i in (1, 2, 3):
            m = jnp.mean(y, axis=(1, 2), keepdims=True)
            v = jnp.mean((y - m) ** 2, axis=(1, 2), keepdims=True)
            y = (y - m) * lax.rsqrt(v + 1e-5)
        if i in (0, 1, 2, 3):
            y = jnp.where(y > 0, y, 0.2 * y)
        outs.append(y)
        h = y
    return outs


if __name__ == "__main__":
    key = jax.random.PRNGKey(0)
    k_param, k_x = jax.random.split(key)

    n_D = 1
    input_ch, output_ch, n_df = 3, 1, 8          # small, consistent with module
    all_params = [init_patch_discriminator(k_param, input_ch, output_ch, n_df)
                  for _ in range(n_D)]

    # PyTorch-style NCHW input (B=2, C=input_ch+output_ch=4, H=W=32)
    x_nchw = jax.random.normal(k_x, (2, input_ch + output_ch, 32, 32),
                               jnp.float32)

    fwd = jax.jit(functools.partial(discriminator_forward, n_D=n_D))
    result = fwd(all_params, x_nchw)
    result = jax.block_until_ready(result)

    # Correctness check vs. pure-JAX reference (same bf16/f32-accum numerics)
    x_nhwc = jnp.transpose(x_nchw, (0, 2, 3, 1))
    ref = reference_patch_forward(all_params[0], x_nhwc)
    for got_nchw, want_nhwc in zip(result[0], ref):
        want_nchw = jnp.transpose(want_nhwc, (0, 3, 1, 2))
        assert got_nchw.shape == want_nchw.shape
        err = float(jnp.max(jnp.abs(got_nchw - want_nchw)))
        assert err < 5e-3, f"mismatch vs reference: {err}"

    print("KERNEL_OK")
</pallas_src>

<mosaic_0001>
module attributes {stable_mosaic.version = 11 : i64} {
  func.func @_conv_matmul_kernel(%arg0: i32, %arg1: memref<256x64xbf16, #tpu.memory_space<vmem>>, %arg2: memref<64x128xbf16, #tpu.memory_space<vmem>>, %arg3: memref<1x128xf32, #tpu.memory_space<vmem>>, %arg4: memref<256x128xf32, #tpu.memory_space<vmem>>) attributes {dimension_semantics = [#tpu.dimension_semantics<parallel>], iteration_bounds = array<i64: 2>, scalar_prefetch = 0 : i64, scratch_operands = 0 : i64, tpu.core_type = #tpu.core_type<tc>, window_params = [{transform_indices = @transform_0, window_bounds = array<i64: 256, 64>}, {pipeline_mode = #tpu.pipeline_mode<synchronous>, transform_indices = @transform_1, window_bounds = array<i64: 64, 128>}, {pipeline_mode = #tpu.pipeline_mode<synchronous>, transform_indices = @transform_2, window_bounds = array<i64: 1, 128>}, {transform_indices = @transform_3, window_bounds = array<i64: 256, 128>}]} {
    %c0 = arith.constant 0 : index
    %c0_0 = arith.constant 0 : index
    %0 = vector.load %arg1[%c0, %c0_0] : memref<256x64xbf16, #tpu.memory_space<vmem>>, vector<256x64xbf16>
    %c0_1 = arith.constant 0 : index
    %c0_2 = arith.constant 0 : index
    %1 = vector.load %arg2[%c0_1, %c0_2] : memref<64x128xbf16, #tpu.memory_space<vmem>>, vector<64x128xbf16>
    %cst = arith.constant dense<0.000000e+00> : vector<256x128xf32>
    %2 = tpu.matmul %0, %1, %cst {dimension_numbers = #tpu.dot_dimension_numbers<[1], [0], [0], [1], [0, 0, 1, 1], [], []>} : vector<256x64xbf16>, vector<64x128xbf16>, vector<256x128xf32> -> vector<256x128xf32>
    %c0_3 = arith.constant 0 : index
    %c0_4 = arith.constant 0 : index
    %3 = vector.load %arg3[%c0_3, %c0_4] : memref<1x128xf32, #tpu.memory_space<vmem>>, vector<1x128xf32>
    %4 = vector.broadcast %3 : vector<1x128xf32> to vector<256x128xf32>
    %5 = arith.addf %2, %4 : vector<256x128xf32>
    %cst_5 = arith.constant 0.000000e+00 : f32
    %6 = vector.broadcast %cst_5 : f32 to vector<256x128xf32>
    %7 = arith.cmpf ogt, %5, %6 : vector<256x128xf32>
    %cst_6 = arith.constant 2.000000e-01 : f32
    %8 = vector.broadcast %cst_6 : f32 to vector<256x128xf32>
    %9 = arith.mulf %8, %5 : vector<256x128xf32>
    %10 = arith.select %7, %5, %9 : vector<256x128xi1>, vector<256x128xf32>
    %c0_7 = arith.constant 0 : index
    %c0_8 = arith.constant 0 : index
    %11 = vector.load %arg4[%c0_7, %c0_8] : memref<256x128xf32, #tpu.memory_space<vmem>>, vector<256x128xf32>
    tpu.vector_store %arg4[%c0_7, %c0_8], %10 {strides = array<i32>} : memref<256x128xf32, #tpu.memory_space<vmem>>, vector<256x128xf32>,
    return
  }
  func.func @transform_0(%arg0: i32) -> (i32, i32) {
    %c0_i32 = arith.constant 0 : i32
    %c0_i32_0 = arith.constant 0 : i32
    return %arg0, %c0_i32 : i32, i32
  }
  func.func @transform_1(%arg0: i32) -> (i32, i32) {
    %c0_i32 = arith.constant 0 : i32
    %c0_i32_0 = arith.constant 0 : i32
    %c0_i32_1 = arith.constant 0 : i32
    return %c0_i32, %c0_i32_0 : i32, i32
  }
  func.func @transform_2(%arg0: i32) -> (i32, i32) {
    %c0_i32 = arith.constant 0 : i32
    %c0_i32_0 = arith.constant 0 : i32
    %c0_i32_1 = arith.constant 0 : i32
    return %c0_i32, %c0_i32_0 : i32, i32
  }
  func.func @transform_3(%arg0: i32) -> (i32, i32) {
    %c0_i32 = arith.constant 0 : i32
    %c0_i32_0 = arith.constant 0 : i32
    return %arg0, %c0_i32 : i32, i32
  }
}

module attributes {stable_mosaic.version = 11 : i64} {
  func.func @_conv_in_leaky_kernel(%arg0: i32, %arg1: memref<1x64x128xbf16, #tpu.memory_space<vmem>>, %arg2: memref<128x128xbf16, #tpu.memory_space<vmem>>, %arg3: memref<1x128xf32, #tpu.memory_space<vmem>>, %arg4: memref<1x64x128xf32, #tpu.memory_space<vmem>>) attributes {dimension_semantics = [#tpu.dimension_semantics<parallel>], iteration_bounds = array<i64: 2>, scalar_prefetch = 0 : i64, scratch_operands = 0 : i64, tpu.core_type = #tpu.core_type<tc>, window_params = [{transform_indices = @transform_0, window_bounds = array<i64: 1, 64, 128>}, {pipeline_mode = #tpu.pipeline_mode<synchronous>, transform_indices = @transform_1, window_bounds = array<i64: 128, 128>}, {pipeline_mode = #tpu.pipeline_mode<synchronous>, transform_indices = @transform_2, window_bounds = array<i64: 1, 128>}, {transform_indices = @transform_3, window_bounds = array<i64: 1, 64, 128>}]} {
    %c0 = arith.constant 0 : index
    %c0_0 = arith.constant 0 : index
    %c0_1 = arith.constant 0 : index
    %0 = vector.load %arg1[%c0, %c0_0, %c0_1] : memref<1x64x128xbf16, #tpu.memory_space<vmem>>, vector<1x64x128xbf16>
    %1 = vector.shape_cast %0 : vector<1x64x128xbf16> to vector<64x128xbf16>
    %c0_2 = arith.constant 0 : index
    %c0_3 = arith.constant 0 : index
    %2 = vector.load %arg2[%c0_2, %c0_3] : memref<128x128xbf16, #tpu.memory_space<vmem>>, vector<128x128xbf16>
    %cst = arith.constant dense<0.000000e+00> : vector<64x128xf32>
    %3 = tpu.matmul %1, %2, %cst {dimension_numbers = #tpu.dot_dimension_numbers<[1], [0], [0], [1], [0, 0, 1, 1], [], []>} : vector<64x128xbf16>, vector<128x128xbf16>, vector<64x128xf32> -> vector<64x128xf32>
    %c0_4 = arith.constant 0 : index
    %c0_5 = arith.constant 0 : index
    %4 = vector.load %arg3[%c0_4, %c0_5] : memref<1x128xf32, #tpu.memory_space<vmem>>, vector<1x128xf32>
    %5 = vector.broadcast %4 : vector<1x128xf32> to vector<64x128xf32>
    %6 = arith.addf %3, %5 : vector<64x128xf32>
    %cst_6 = arith.constant dense<0.000000e+00> : vector<128xf32>
    %7 = vector.multi_reduction <add>, %6, %cst_6 [0] : vector<64x128xf32> to vector<128xf32>
    %8 = vector.shape_cast %7 : vector<128xf32> to vector<1x128xf32>
    %9 = arith.mulf %6, %6 : vector<64x128xf32>
    %cst_7 = arith.constant dense<0.000000e+00> : vector<128xf32>
    %10 = vector.multi_reduction <add>, %9, %cst_7 [0] : vector<64x128xf32> to vector<128xf32>
    %11 = vector.shape_cast %10 : vector<128xf32> to vector<1x128xf32>
    %cst_8 = arith.constant 1.562500e-02 : f32
    %12 = vector.broadcast %cst_8 : f32 to vector<1x128xf32>
    %13 = arith.mulf %8, %12 : vector<1x128xf32>
    %cst_9 = arith.constant 1.562500e-02 : f32
    %14 = vector.broadcast %cst_9 : f32 to vector<1x128xf32>
    %15 = arith.mulf %11, %14 : vector<1x128xf32>
    %16 = arith.mulf %13, %13 : vector<1x128xf32>
    %17 = arith.subf %15, %16 : vector<1x128xf32>
    %cst_10 = arith.constant 0.000000e+00 : f32
    %18 = vector.broadcast %cst_10 : f32 to vector<1x128xf32>
    %19 = arith.maximumf %17, %18 : vector<1x128xf32>
    %20 = vector.broadcast %13 : vector<1x128xf32> to vector<64x128xf32>
    %21 = arith.subf %6, %20 : vector<64x128xf32>
    %cst_11 = arith.constant 9.99999974E-6 : f32
    %22 = vector.broadcast %cst_11 : f32 to vector<1x128xf32>
    %23 = arith.addf %19, %22 : vector<1x128xf32>
    %24 = math.rsqrt %23 : vector<1x128xf32>
    %25 = vector.broadcast %24 : vector<1x128xf32> to vector<64x128xf32>
    %26 = arith.mulf %21, %25 : vector<64x128xf32>
    %cst_12 = arith.constant 0.000000e+00 : f32
    %27 = vector.broadcast %cst_12 : f32 to vector<64x128xf32>
    %28 = arith.cmpf ogt, %26, %27 : vector<64x128xf32>
    %cst_13 = arith.constant 2.000000e-01 : f32
    %29 = vector.broadcast %cst_13 : f32 to vector<64x128xf32>
    %30 = arith.mulf %29, %26 : vector<64x128xf32>
    %31 = arith.select %28, %26, %30 : vector<64x128xi1>, vector<64x128xf32>
    %c0_14 = arith.constant 0 : index
    %c0_15 = arith.constant 0 : index
    %c0_16 = arith.constant 0 : index
    %32 = vector.load %arg4[%c0_14, %c0_15, %c0_16] : memref<1x64x128xf32, #tpu.memory_space<vmem>>, vector<1x64x128xf32>
    %33 = vector.shape_cast %32 : vector<1x64x128xf32> to vector<64x128xf32>
    %34 = vector.shape_cast %31 : vector<64x128xf32> to vector<1x64x128xf32>
    tpu.vector_store %arg4[%c0_14, %c0_15, %c0_16], %34 {strides = array<i32>} : memref<1x64x128xf32, #tpu.memory_space<vmem>>, vector<1x64x128xf32>,
    return
  }
  func.func @transform_0(%arg0: i32) -> (i32, i32, i32) {
    %c0_i32 = arith.constant 0 : i32
    %c0_i32_0 = arith.constant 0 : i32
    %c0_i32_1 = arith.constant 0 : i32
    return %arg0, %c0_i32, %c0_i32_0 : i32, i32, i32
  }
  func.func @transform_1(%arg0: i32) -> (i32, i32) {
    %c0_i32 = arith.constant 0 : i32
    %c0_i32_0 = arith.constant 0 : i32
    %c0_i32_1 = arith.constant 0 : i32
    return %c0_i32, %c0_i32_0 : i32, i32
  }
  func.func @transform_2(%arg0: i32) -> (i32, i32) {
    %c0_i32 = arith.constant 0 : i32
    %c0_i32_0 = arith.constant 0 : i32
    %c0_i32_1 = arith.constant 0 : i32
    return %c0_i32, %c0_i32_0 : i32, i32
  }
  func.func @transform_3(%arg0: i32) -> (i32, i32, i32) {
    %c0_i32 = arith.constant 0 : i32
    %c0_i32_0 = arith.constant 0 : i32
    %c0_i32_1 = arith.constant 0 : i32
    return %arg0, %c0_i32, %c0_i32_0 : i32, i32, i32
  }
}

module attributes {stable_mosaic.version = 11 : i64} {
  func.func @_conv_in_leaky_kernel(%arg0: i32, %arg1: memref<1x16x256xbf16, #tpu.memory_space<vmem>>, %arg2: memref<256x128xbf16, #tpu.memory_space<vmem>>, %arg3: memref<1x128xf32, #tpu.memory_space<vmem>>, %arg4: memref<1x16x128xf32, #tpu.memory_space<vmem>>) attributes {dimension_semantics = [#tpu.dimension_semantics<parallel>], iteration_bounds = array<i64: 2>, scalar_prefetch = 0 : i64, scratch_operands = 0 : i64, tpu.core_type = #tpu.core_type<tc>, window_params = [{transform_indices = @transform_0, window_bounds = array<i64: 1, 16, 256>}, {pipeline_mode = #tpu.pipeline_mode<synchronous>, transform_indices = @transform_1, window_bounds = array<i64: 256, 128>}, {pipeline_mode = #tpu.pipeline_mode<synchronous>, transform_indices = @transform_2, window_bounds = array<i64: 1, 128>}, {transform_indices = @transform_3, window_bounds = array<i64: 1, 16, 128>}]} {
    %c0 = arith.constant 0 : index
    %c0_0 = arith.constant 0 : index
    %c0_1 = arith.constant 0 : index
    %0 = vector.load %arg1[%c0, %c0_0, %c0_1] : memref<1x16x256xbf16, #tpu.memory_space<vmem>>, vector<1x16x256xbf16>
    %1 = vector.shape_cast %0 : vector<1x16x256xbf16> to vector<16x256xbf16>
    %c0_2 = arith.constant 0 : index
    %c0_3 = arith.constant 0 : index
    %2 = vector.load %arg2[%c0_2, %c0_3] : memref<256x128xbf16, #tpu.memory_space<vmem>>, vector<256x128xbf16>
    %cst = arith.constant dense<0.000000e+00> : vector<16x128xf32>
    %3 = tpu.matmul %1, %2, %cst {dimension_numbers = #tpu.dot_dimension_numbers<[1], [0], [0], [1], [0, 0, 1, 1], [], []>} : vector<16x256xbf16>, vector<256x128xbf16>, vector<16x128xf32> -> vector<16x128xf32>
    %c0_4 = arith.constant 0 : index
    %c0_5 = arith.constant 0 : index
    %4 = vector.load %arg3[%c0_4, %c0_5] : memref<1x128xf32, #tpu.memory_space<vmem>>, vector<1x128xf32>
    %5 = vector.broadcast %4 : vector<1x128xf32> to vector<16x128xf32>
    %6 = arith.addf %3, %5 : vector<16x128xf32>
    %cst_6 = arith.constant dense<0.000000e+00> : vector<128xf32>
    %7 = vector.multi_reduction <add>, %6, %cst_6 [0] : vector<16x128xf32> to vector<128xf32>
    %8 = vector.shape_cast %7 : vector<128xf32> to vector<1x128xf32>
    %9 = arith.mulf %6, %6 : vector<16x128xf32>
    %cst_7 = arith.constant dense<0.000000e+00> : vector<128xf32>
    %10 = vector.multi_reduction <add>, %9, %cst_7 [0] : vector<16x128xf32> to vector<128xf32>
    %11 = vector.shape_cast %10 : vector<128xf32> to vector<1x128xf32>
    %cst_8 = arith.constant 6.250000e-02 : f32
    %12 = vector.broadcast %cst_8 : f32 to vector<1x128xf32>
    %13 = arith.mulf %8, %12 : vector<1x128xf32>
    %cst_9 = arith.constant 6.250000e-02 : f32
    %14 = vector.broadcast %cst_9 : f32 to vector<1x128xf32>
    %15 = arith.mulf %11, %14 : vector<1x128xf32>
    %16 = arith.mulf %13, %13 : vector<1x128xf32>
    %17 = arith.subf %15, %16 : vector<1x128xf32>
    %cst_10 = arith.constant 0.000000e+00 : f32
    %18 = vector.broadcast %cst_10 : f32 to vector<1x128xf32>
    %19 = arith.maximumf %17, %18 : vector<1x128xf32>
    %20 = vector.broadcast %13 : vector<1x128xf32> to vector<16x128xf32>
    %21 = arith.subf %6, %20 : vector<16x128xf32>
    %cst_11 = arith.constant 9.99999974E-6 : f32
    %22 = vector.broadcast %cst_11 : f32 to vector<1x128xf32>
    %23 = arith.addf %19, %22 : vector<1x128xf32>
    %24 = math.rsqrt %23 : vector<1x128xf32>
    %25 = vector.broadcast %24 : vector<1x128xf32> to vector<16x128xf32>
    %26 = arith.mulf %21, %25 : vector<16x128xf32>
    %cst_12 = arith.constant 0.000000e+00 : f32
    %27 = vector.broadcast %cst_12 : f32 to vector<16x128xf32>
    %28 = arith.cmpf ogt, %26, %27 : vector<16x128xf32>
    %cst_13 = arith.constant 2.000000e-01 : f32
    %29 = vector.broadcast %cst_13 : f32 to vector<16x128xf32>
    %30 = arith.mulf %29, %26 : vector<16x128xf32>
    %31 = arith.select %28, %26, %30 : vector<16x128xi1>, vector<16x128xf32>
    %c0_14 = arith.constant 0 : index
    %c0_15 = arith.constant 0 : index
    %c0_16 = arith.constant 0 : index
    %32 = vector.load %arg4[%c0_14, %c0_15, %c0_16] : memref<1x16x128xf32, #tpu.memory_space<vmem>>, vector<1x16x128xf32>
    %33 = vector.shape_cast %32 : vector<1x16x128xf32> to vector<16x128xf32>
    %34 = vector.shape_cast %31 : vector<16x128xf32> to vector<1x16x128xf32>
    tpu.vector_store %arg4[%c0_14, %c0_15, %c0_16], %34 {strides = array<i32>} : memref<1x16x128xf32, #tpu.memory_space<vmem>>, vector<1x16x128xf32>,
    return
  }
  func.func @transform_0(%arg0: i32) -> (i32, i32, i32) {
    %c0_i32 = arith.constant 0 : i32
    %c0_i32_0 = arith.constant 0 : i32
    %c0_i32_1 = arith.constant 0 : i32
    return %arg0, %c0_i32, %c0_i32_0 : i32, i32, i32
  }
  func.func @transform_1(%arg0: i32) -> (i32, i32) {
    %c0_i32 = arith.constant 0 : i32
    %c0_i32_0 = arith.constant 0 : i32
    %c0_i32_1 = arith.constant 0 : i32
    return %c0_i32, %c0_i32_0 : i32, i32
  }
  func.func @transform_2(%arg0: i32) -> (i32, i32) {
    %c0_i32 = arith.constant 0 : i32
    %c0_i32_0 = arith.constant 0 : i32
    %c0_i32_1 = arith.constant 0 : i32
    return %c0_i32, %c0_i32_0 : i32, i32
  }
  func.func @transform_3(%arg0: i32) -> (i32, i32, i32) {
    %c0_i32 = arith.constant 0 : i32
    %c0_i32_0 = arith.constant 0 : i32
    %c0_i32_1 = arith.constant 0 : i32
    return %arg0, %c0_i32, %c0_i32_0 : i32, i32, i32
  }
}

module attributes {stable_mosaic.version = 11 : i64} {
  func.func @_conv_in_leaky_kernel(%arg0: i32, %arg1: memref<1x9x512xbf16, #tpu.memory_space<vmem>>, %arg2: memref<512x128xbf16, #tpu.memory_space<vmem>>, %arg3: memref<1x128xf32, #tpu.memory_space<vmem>>, %arg4: memref<1x9x128xf32, #tpu.memory_space<vmem>>) attributes {dimension_semantics = [#tpu.dimension_semantics<parallel>], iteration_bounds = array<i64: 2>, scalar_prefetch = 0 : i64, scratch_operands = 0 : i64, tpu.core_type = #tpu.core_type<tc>, window_params = [{transform_indices = @transform_0, window_bounds = array<i64: 1, 9, 512>}, {pipeline_mode = #tpu.pipeline_mode<synchronous>, transform_indices = @transform_1, window_bounds = array<i64: 512, 128>}, {pipeline_mode = #tpu.pipeline_mode<synchronous>, transform_indices = @transform_2, window_bounds = array<i64: 1, 128>}, {transform_indices = @transform_3, window_bounds = array<i64: 1, 9, 128>}]} {
    %c0 = arith.constant 0 : index
    %c0_0 = arith.constant 0 : index
    %c0_1 = arith.constant 0 : index
    %0 = vector.load %arg1[%c0, %c0_0, %c0_1] : memref<1x9x512xbf16, #tpu.memory_space<vmem>>, vector<1x9x512xbf16>
    %1 = vector.shape_cast %0 : vector<1x9x512xbf16> to vector<9x512xbf16>
    %c0_2 = arith.constant 0 : index
    %c0_3 = arith.constant 0 : index
    %2 = vector.load %arg2[%c0_2, %c0_3] : memref<512x128xbf16, #tpu.memory_space<vmem>>, vector<512x128xbf16>
    %cst = arith.constant dense<0.000000e+00> : vector<9x128xf32>
    %3 = tpu.matmul %1, %2, %cst {dimension_numbers = #tpu.dot_dimension_numbers<[1], [0], [0], [1], [0, 0, 1, 1], [], []>} : vector<9x512xbf16>, vector<512x128xbf16>, vector<9x128xf32> -> vector<9x128xf32>
    %c0_4 = arith.constant 0 : index
    %c0_5 = arith.constant 0 : index
    %4 = vector.load %arg3[%c0_4, %c0_5] : memref<1x128xf32, #tpu.memory_space<vmem>>, vector<1x128xf32>
    %5 = vector.broadcast %4 : vector<1x128xf32> to vector<9x128xf32>
    %6 = arith.addf %3, %5 : vector<9x128xf32>
    %cst_6 = arith.constant dense<0.000000e+00> : vector<128xf32>
    %7 = vector.multi_reduction <add>, %6, %cst_6 [0] : vector<9x128xf32> to vector<128xf32>
    %8 = vector.shape_cast %7 : vector<128xf32> to vector<1x128xf32>
    %9 = arith.mulf %6, %6 : vector<9x128xf32>
    %cst_7 = arith.constant dense<0.000000e+00> : vector<128xf32>
    %10 = vector.multi_reduction <add>, %9, %cst_7 [0] : vector<9x128xf32> to vector<128xf32>
    %11 = vector.shape_cast %10 : vector<128xf32> to vector<1x128xf32>
    %cst_8 = arith.constant 0.111111112 : f32
    %12 = vector.broadcast %cst_8 : f32 to vector<1x128xf32>
    %13 = arith.mulf %8, %12 : vector<1x128xf32>
    %cst_9 = arith.constant 0.111111112 : f32
    %14 = vector.broadcast %cst_9 : f32 to vector<1x128xf32>
    %15 = arith.mulf %11, %14 : vector<1x128xf32>
    %16 = arith.mulf %13, %13 : vector<1x128xf32>
    %17 = arith.subf %15, %16 : vector<1x128xf32>
    %cst_10 = arith.constant 0.000000e+00 : f32
    %18 = vector.broadcast %cst_10 : f32 to vector<1x128xf32>
    %19 = arith.maximumf %17, %18 : vector<1x128xf32>
    %20 = vector.broadcast %13 : vector<1x128xf32> to vector<9x128xf32>
    %21 = arith.subf %6, %20 : vector<9x128xf32>
    %cst_11 = arith.constant 9.99999974E-6 : f32
    %22 = vector.broadcast %cst_11 : f32 to vector<1x128xf32>
    %23 = arith.addf %19, %22 : vector<1x128xf32>
    %24 = math.rsqrt %23 : vector<1x128xf32>
    %25 = vector.broadcast %24 : vector<1x128xf32> to vector<9x128xf32>
    %26 = arith.mulf %21, %25 : vector<9x128xf32>
    %cst_12 = arith.constant 0.000000e+00 : f32
    %27 = vector.broadcast %cst_12 : f32 to vector<9x128xf32>
    %28 = arith.cmpf ogt, %26, %27 : vector<9x128xf32>
    %cst_13 = arith.constant 2.000000e-01 : f32
    %29 = vector.broadcast %cst_13 : f32 to vector<9x128xf32>
    %30 = arith.mulf %29, %26 : vector<9x128xf32>
    %31 = arith.select %28, %26, %30 : vector<9x128xi1>, vector<9x128xf32>
    %c0_14 = arith.constant 0 : index
    %c0_15 = arith.constant 0 : index
    %c0_16 = arith.constant 0 : index
    %32 = vector.load %arg4[%c0_14, %c0_15, %c0_16] : memref<1x9x128xf32, #tpu.memory_space<vmem>>, vector<1x9x128xf32>
    %33 = vector.shape_cast %32 : vector<1x9x128xf32> to vector<9x128xf32>
    %34 = vector.shape_cast %31 : vector<9x128xf32> to vector<1x9x128xf32>
    tpu.vector_store %arg4[%c0_14, %c0_15, %c0_16], %34 {strides = array<i32>} : memref<1x9x128xf32, #tpu.memory_space<vmem>>, vector<1x9x128xf32>,
    return
  }
  func.func @transform_0(%arg0: i32) -> (i32, i32, i32) {
    %c0_i32 = arith.constant 0 : i32
    %c0_i32_0 = arith.constant 0 : i32
    %c0_i32_1 = arith.constant 0 : i32
    return %arg0, %c0_i32, %c0_i32_0 : i32, i32, i32
  }
  func.func @transform_1(%arg0: i32) -> (i32, i32) {
    %c0_i32 = arith.constant 0 : i32
    %c0_i32_0 = arith.constant 0 : i32
    %c0_i32_1 = arith.constant 0 : i32
    return %c0_i32, %c0_i32_0 : i32, i32
  }
  func.func @transform_2(%arg0: i32) -> (i32, i32) {
    %c0_i32 = arith.constant 0 : i32
    %c0_i32_0 = arith.constant 0 : i32
    %c0_i32_1 = arith.constant 0 : i32
    return %c0_i32, %c0_i32_0 : i32, i32
  }
  func.func @transform_3(%arg0: i32) -> (i32, i32, i32) {
    %c0_i32 = arith.constant 0 : i32
    %c0_i32_0 = arith.constant 0 : i32
    %c0_i32_1 = arith.constant 0 : i32
    return %arg0, %c0_i32, %c0_i32_0 : i32, i32, i32
  }
}

module attributes {stable_mosaic.version = 11 : i64} {
  func.func @_conv_matmul_kernel(%arg0: i32, %arg1: memref<8x1024xbf16, #tpu.memory_space<vmem>>, %arg2: memref<1024x128xbf16, #tpu.memory_space<vmem>>, %arg3: memref<1x128xf32, #tpu.memory_space<vmem>>, %arg4: memref<8x128xf32, #tpu.memory_space<vmem>>) attributes {dimension_semantics = [#tpu.dimension_semantics<parallel>], iteration_bounds = array<i64: 1>, scalar_prefetch = 0 : i64, scratch_operands = 0 : i64, tpu.core_type = #tpu.core_type<tc>, window_params = [{transform_indices = @transform_0, window_bounds = array<i64: 8, 1024>}, {pipeline_mode = #tpu.pipeline_mode<synchronous>, transform_indices = @transform_1, window_bounds = array<i64: 1024, 128>}, {pipeline_mode = #tpu.pipeline_mode<synchronous>, transform_indices = @transform_2, window_bounds = array<i64: 1, 128>}, {transform_indices = @transform_3, window_bounds = array<i64: 8, 128>}]} {
    %c0 = arith.constant 0 : index
    %c0_0 = arith.constant 0 : index
    %0 = vector.load %arg1[%c0, %c0_0] : memref<8x1024xbf16, #tpu.memory_space<vmem>>, vector<8x1024xbf16>
    %c0_1 = arith.constant 0 : index
    %c0_2 = arith.constant 0 : index
    %1 = vector.load %arg2[%c0_1, %c0_2] : memref<1024x128xbf16, #tpu.memory_space<vmem>>, vector<1024x128xbf16>
    %cst = arith.constant dense<0.000000e+00> : vector<8x128xf32>
    %2 = tpu.matmul %0, %1, %cst {dimension_numbers = #tpu.dot_dimension_numbers<[1], [0], [0], [1], [0, 0, 1, 1], [], []>} : vector<8x1024xbf16>, vector<1024x128xbf16>, vector<8x128xf32> -> vector<8x128xf32>
    %c0_3 = arith.constant 0 : index
    %c0_4 = arith.constant 0 : index
    %3 = vector.load %arg3[%c0_3, %c0_4] : memref<1x128xf32, #tpu.memory_space<vmem>>, vector<1x128xf32>
    %4 = vector.broadcast %3 : vector<1x128xf32> to vector<8x128xf32>
    %5 = arith.addf %2, %4 : vector<8x128xf32>
    %c0_5 = arith.constant 0 : index
    %c0_6 = arith.constant 0 : index
    %6 = vector.load %arg4[%c0_5, %c0_6] : memref<8x128xf32, #tpu.memory_space<vmem>>, vector<8x128xf32>
    tpu.vector_store %arg4[%c0_5, %c0_6], %5 {strides = array<i32>} : memref<8x128xf32, #tpu.memory_space<vmem>>, vector<8x128xf32>,
    return
  }
  func.func @transform_0(%arg0: i32) -> (i32, i32) {
    %c0_i32 = arith.constant 0 : i32
    %c0_i32_0 = arith.constant 0 : i32
    return %arg0, %c0_i32 : i32, i32
  }
  func.func @transform_1(%arg0: i32) -> (i32, i32) {
    %c0_i32 = arith.constant 0 : i32
    %c0_i32_0 = arith.constant 0 : i32
    %c0_i32_1 = arith.constant 0 : i32
    return %c0_i32, %c0_i32_0 : i32, i32
  }
  func.func @transform_2(%arg0: i32) -> (i32, i32) {
    %c0_i32 = arith.constant 0 : i32
    %c0_i32_0 = arith.constant 0 : i32
    %c0_i32_1 = arith.constant 0 : i32
    return %c0_i32, %c0_i32_0 : i32, i32
  }
  func.func @transform_3(%arg0: i32) -> (i32, i32) {
    %c0_i32 = arith.constant 0 : i32
    %c0_i32_0 = arith.constant 0 : i32
    return %arg0, %c0_i32 : i32, i32
  }
}

</mosaic_0001>

<bundles_post_ra>
// kernel: discriminator_forward.5
= control target key start
LH: loop header
LB: loop body
LE: loop exit
PB: predicated region body
PF: predicated region fallthrough
CT: control target
= control target key end

     0   :  { %s892_s12 = smov 0   ;;  %s1030_s0 = inlined_call_operand.vmem [shape: bf16[512,64], index: 0, kind: input, shape index: {}]   ;;  %s1031_s1 = inlined_call_operand.vmem [shape: bf16[64,128], index: 1, kind: input, shape index: {}]   ;;  %s1032_s2 = inlined_call_operand.vmem [shape: f32[1,128], index: 2, kind: input, shape index: {}]   ;;  %s1033_s3 = inlined_call_operand.vmem [shape: f32[512,128], index: 3, kind: output, shape index: {}]  }
   0x1 LB: > { %s720_s13 = sadd.s32 4294967295, %s870_s12   ;;  %p724_p0 = scmp.ge.s32.totalorder %s870_s12, 1  ;;  %s870_s12 = sphi %s892_s12, %s13_s12  }
   0x2   : > { %p138_p1 = scmp.lt.s32.totalorder %s870_s12, 3 }
   0x4   : > { %p139_p2 = pnand %p724_p0, %p138_p1 }
   0x5   : > { %v844_v0 = vld [vmem:[%s1031_s1] sm:$0xff] (!%p139_p2)   ;;  %s725_s16 = sshll.u32 (!%p139_p2), %s720_s13, 5  ;;  %v845_v1 = vld [vmem:[%s1031_s1 + $0x8] sm:$0xff] (!%p139_p2)   ;;  %v846_v2 = vld [vmem:[%s1031_s1 + $0x10] sm:$0xff] (!%p139_p2)   ;;  %vm326_vm0 = vcmask (!%p139_p2), 523264  }
   0x6   : > { %142 = sbr.rel (%p139_p2) target bundleno = 271 (0x10f), region = 32  ;;  %p163_p3 = scmp.lt.s32.totalorder (!%p139_p2), %s725_s16, 63  ;;  %788 = vmatprep.subr.bf16.mxu0 (!%p139_p2), %v844_v0  ;;  %828 = vmatprep.subr.bf16.mxu1 (!%p139_p2), %v844_v0  ;;  %v847_v3 = vld [vmem:[%s1031_s1 + $0x18] sm:$0xff] (!%p139_p2)   ;;  %v955_v20 = vld [vmem:[%s1032_s2] ss:$0 sm:$0xff] (!%p139_p2) }
   0x7   : > { %789 = vmatpush3.bf16.msra.mxu0 (!%p139_p2), %v844_v0  ;;  %832 = vmatpush3.bf16.msra.mxu1 (!%p139_p2), %v844_v0 }
   0x8   : > { %790 = vmatprep.subr.bf16.mxu0 (!%p139_p2), %v845_v1  ;;  %829 = vmatprep.subr.bf16.mxu1 (!%p139_p2), %v845_v1 }
   0xb   : > { %791 = vmatpush3.bf16.msra.mxu0 (!%p139_p2), %v845_v1  ;;  %833 = vmatpush3.bf16.msra.mxu1 (!%p139_p2), %v845_v1 }
   0xc   : > { %792 = vmatprep.subr.bf16.mxu0 (!%p139_p2), %v846_v2  ;;  %830 = vmatprep.subr.bf16.mxu1 (!%p139_p2), %v846_v2 }
   0xd   : > { %s1035_s16 = smov (!%p163_p3, %s725_s16), 63 }
   0xe   : > { %s726_s21 = sshll.u32 %s1035_s16, 2  ;;  %s728_s29 = sshll.u32 %s1035_s16, 3 }
   0xf   : > { %s918_s26 = scalar_lea.vmem %s1030_s0, %s726_s21  ;;  %793 = vmatpush3.bf16.msra.mxu0 %v846_v2  ;;  %834 = vmatpush3.bf16.msra.mxu1 %v846_v2  ;;  %s965_s5 = scalar_lea.vmem %s1033_s3, %s728_s29 }
  0x10   : > { %v848_v4 = vld [vmem:[%s918_s26] sm:$0xff]   ;;  %794 = vmatprep.subr.bf16.mxu0 %v847_v3  ;;  %831 = vmatprep.subr.bf16.mxu1 %v847_v3  ;;  %v850_v6 = vld [vmem:[%s918_s26 + $0x8] sm:$0xff]   ;;  %v852_v8 = vld [vmem:[%s918_s26 + $0x10] sm:$0xff]  }
  0x11   : > { %v849_v5 = vld [vmem:[%s918_s26 + $0x40] sm:$0xff]   ;;  %796 = vmatprep.mubr.msk.bf16.mxu0 %vm326_vm0, %v848_v4  ;;  %v851_v7 = vld [vmem:[%s918_s26 + $0x48] sm:$0xff]   ;;  %v853_v9 = vld [vmem:[%s918_s26 + $0x50] sm:$0xff]  }
  0x12   : > { %812 = vmatprep.mubr.msk.bf16.mxu1 %vm326_vm0, %v849_v5  ;;  %v854_v10 = vld [vmem:[%s918_s26 + $0x18] sm:$0xff]   ;;  %v856_v12 = vld [vmem:[%s918_s26 + $0x20] sm:$0xff]   ;;  %v858_v14 = vld [vmem:[%s918_s26 + $0x28] sm:$0xff]  }
  0x13   : > { %795 = vmatpush3.bf16.msra.mxu0 %v847_v3  ;;  %835 = vmatpush3.bf16.msra.mxu1 %v847_v3  ;;  %v855_v11 = vld [vmem:[%s918_s26 + $0x58] sm:$0xff]   ;;  %v857_v13 = vld [vmem:[%s918_s26 + $0x60] sm:$0xff]   ;;  %v859_v15 = vld [vmem:[%s918_s26 + $0x68] sm:$0xff]  }
  0x14   : > { %v860_v16 = vld [vmem:[%s918_s26 + $0x30] sm:$0xff]   ;;  %v862_v18 = vld [vmem:[%s918_s26 + $0x38] sm:$0xff]  }
  0x15   : > { %v861_v17 = vld [vmem:[%s918_s26 + $0x70] sm:$0xff]   ;;  %v863_v19 = vld [vmem:[%s918_s26 + $0x78] sm:$0xff]  }
  0x16   : > { %797 = vmatmul.mubr.msk.bf16.vlgmr.msra.gmra.mrb[0].mxu0 %vm326_vm0, %v850_v6  ;;  %813 = vmatmul.mubr.msk.bf16.vlgmr.msra.gmra.mrb[0].mxu1 %vm326_vm0, %v851_v7 }
  0x17   : > { %800 = vmatprep.mubr.msk.bf16.mxu0 %vm326_vm0, %v852_v8  ;;  %816 = vmatprep.mubr.msk.bf16.mxu1 %vm326_vm0, %v853_v9 }
  0x1e   : > { %801 = vmatmul.mubr.msk.bf16.gmra.mrb[4].mxu0 %vm326_vm0, %v854_v10  ;;  %817 = vmatmul.mubr.msk.bf16.gmra.mrb[4].mxu1 %vm326_vm0, %v855_v11 }
  0x1f   : > { %804 = vmatprep.mubr.msk.bf16.mxu0 %vm326_vm0, %v856_v12  ;;  %820 = vmatprep.mubr.msk.bf16.mxu1 %vm326_vm0, %v857_v13 }
  0x26   : > { %805 = vmatmul.mubr.msk.bf16.gmra.mrb[8].mxu0 %vm326_vm0, %v858_v14  ;;  %821 = vmatmul.mubr.msk.bf16.gmra.mrb[8].mxu1 %vm326_vm0, %v859_v15 }
  0x27   : > { %808 = vmatprep.mubr.msk.bf16.mxu0 %vm326_vm0, %v860_v16  ;;  %824 = vmatprep.mubr.msk.bf16.mxu1 %vm326_vm0, %v861_v17 }
  0x2e   : > { %809 = vmatmul.mubr.msk.bf16.gmra.mrb[12].mxu0 %vm326_vm0, %v862_v18  ;;  %825 = vmatmul.mubr.msk.bf16.gmra.mrb[12].mxu1 %vm326_vm0, %v863_v19 }
  0xe9   : > { %v798_v21 = vpop.f32.mrb[0].mxu0  ;;  %v814_v22 = vpop.f32.mrb[0].mxu1 }
  0xea   : > { %v418_v23 = vadd.f32 %v798_v21, %v955_v20  ;;  %v482_v24 = vadd.f32 %v814_v22, %v955_v20  ;;  %v409_v25 = vpop.f32.mrb[1].mxu0  ;;  %v473_v26 = vpop.f32.mrb[1].mxu1 }
  0xeb   : > { %v410_v27 = vadd.f32 %v955_v20, %v409_v25  ;;  %v474_v28 = vadd.f32 %v955_v20, %v473_v26  ;;  %v799_v29 = vpop.f32.mrb[2].mxu0  ;;  %v815_v30 = vpop.f32.mrb[2].mxu1 }
  0xec   : > { %vm538_vm1 = vcmp.gt.f32.partialorder %v418_v23, 0.0  ;;  %v570_v31 = vmul.f32 0.2, %v418_v23  ;;  %vm554_vm2 = vcmp.gt.f32.partialorder %v482_v24, 0.0  ;;  %v586_v32 = vmul.f32 0.2, %v482_v24 }
  0xed   : > { %vm536_vm3 = vcmp.gt.f32.partialorder %v410_v27, 0.0  ;;  %v568_v33 = vmul.f32 0.2, %v410_v27  ;;  %vm552_vm4 = vcmp.gt.f32.partialorder %v474_v28, 0.0  ;;  %v584_v34 = vmul.f32 0.2, %v474_v28 }
  0xee   : > { %v602_v35 = vsel %vm538_vm1, %v418_v23, %v570_v31  ;;  %v618_v36 = vsel %vm554_vm2, %v482_v24, %v586_v32  ;;  %v421_v37 = vadd.f32 %v799_v29, %v955_v20  ;;  %v485_v38 = vadd.f32 %v815_v30, %v955_v20  ;;  %v412_v39 = vpop.f32.mrb[3].mxu0  ;;  %v476_v40 = vpop.f32.mrb[3].mxu1 }
  0xef   : > { %634 = vst [vmem:[%s965_s5 + $0x10] sm:$0xff] %v602_v35  ;;  %650 = vst [vmem:[%s965_s5 + $0x90] sm:$0xff] %v618_v36  ;;  %v600_v41 = vsel %vm536_vm3, %v410_v27, %v568_v33  ;;  %v616_v42 = vsel %vm552_vm4, %v474_v28, %v584_v34  ;;  %v413_v43 = vadd.f32 %v955_v20, %v412_v39 }
  0xf0   : > { %v477_v44 = vadd.f32 %v955_v20, %v476_v40  ;;  %632 = vst [vmem:[%s965_s5] sm:$0xff] %v600_v41  ;;  %648 = vst [vmem:[%s965_s5 + $0x80] sm:$0xff] %v616_v42  ;;  %vm539_vm5 = vcmp.gt.f32.partialorder %v421_v37, 0.0  ;;  %v571_v45 = vmul.f32 0.2, %v421_v37  ;;  %vm555_vm6 = vcmp.gt.f32.partialorder %v485_v38, 0.0 }
  0xf1   : > { %v587_v46 = vmul.f32 0.2, %v485_v38  ;;  %vm537_vm7 = vcmp.gt.f32.partialorder %v413_v43, 0.0  ;;  %v569_v47 = vmul.f32 0.2, %v413_v43  ;;  %v802_v51 = vpop.f32.mrb[4].mxu0 }
  0xf2   : > { %vm553_vm8 = vcmp.gt.f32.partialorder %v477_v44, 0.0  ;;  %v585_v48 = vmul.f32 0.2, %v477_v44  ;;  %v603_v49 = vsel %vm539_vm5, %v421_v37, %v571_v45  ;;  %v818_v52 = vpop.f32.mrb[4].mxu1  ;;  %v434_v55 = vadd.f32 %v802_v51, %v955_v20  ;;  %v425_v57 = vpop.f32.mrb[5].mxu0 }
  0xf3   : > { %v619_v50 = vsel %vm555_vm6, %v485_v38, %v587_v46  ;;  %635 = vst [vmem:[%s965_s5 + $0x18] sm:$0xff] %v603_v49  ;;  %v601_v53 = vsel %vm537_vm7, %v413_v43, %v569_v47  ;;  %v498_v56 = vadd.f32 %v818_v52, %v955_v20  ;;  %v489_v58 = vpop.f32.mrb[5].mxu1  ;;  %v426_v59 = vadd.f32 %v955_v20, %v425_v57  ;;  %v803_v61 = vpop.f32.mrb[6].mxu0 }
  0xf4   : > { %651 = vst [vmem:[%s965_s5 + $0x98] sm:$0xff] %v619_v50  ;;  %v617_v54 = vsel %vm553_vm8, %v477_v44, %v585_v48  ;;  %633 = vst [vmem:[%s965_s5 + $0x8] sm:$0xff] %v601_v53  ;;  %v490_v60 = vadd.f32 %v955_v20, %v489_v58  ;;  %v819_v62 = vpop.f32.mrb[6].mxu1  ;;  %vm542_vm9 = vcmp.gt.f32.partialorder %v434_v55, 0.0  ;;  %v574_v63 = vmul.f32 0.2, %v434_v55 }
  0xf5   : > { %649 = vst [vmem:[%s965_s5 + $0x88] sm:$0xff] %v617_v54  ;;  %vm558_vm10 = vcmp.gt.f32.partialorder %v498_v56, 0.0  ;;  %v590_v0 = vmul.f32 0.2, %v498_v56  ;;  %vm540_vm11 = vcmp.gt.f32.partialorder %v426_v59, 0.0  ;;  %v437_v5 = vadd.f32 %v803_v61, %v955_v20  ;;  %v428_v7 = vpop.f32.mrb[7].mxu0 }
  0xf6   : > { %v572_v1 = vmul.f32 0.2, %v426_v59  ;;  %vm556_vm12 = vcmp.gt.f32.partialorder %v490_v60, 0.0  ;;  %v588_v2 = vmul.f32 0.2, %v490_v60  ;;  %v606_v3 = vsel %vm542_vm9, %v434_v55, %v574_v63  ;;  %v492_v8 = vpop.f32.mrb[7].mxu1 }
  0xf7   : > { %v622_v4 = vsel %vm558_vm10, %v498_v56, %v590_v0  ;;  %v501_v6 = vadd.f32 %v819_v62, %v955_v20  ;;  %638 = vst [vmem:[%s965_s5 + $0x30] sm:$0xff] %v606_v3  ;;  %v429_v11 = vadd.f32 %v955_v20, %v428_v7  ;;  %v493_v12 = vadd.f32 %v955_v20, %v492_v8 }
  0xf8   : > { %654 = vst [vmem:[%s965_s5 + $0xb0] sm:$0xff] %v622_v4  ;;  %v604_v9 = vsel %vm540_vm11, %v426_v59, %v572_v1  ;;  %v620_v10 = vsel %vm556_vm12, %v490_v60, %v588_v2  ;;  %vm543_vm13 = vcmp.gt.f32.partialorder %v437_v5, 0.0  ;;  %v575_v13 = vmul.f32 0.2, %v437_v5 }
  0xf9   : > { %636 = vst [vmem:[%s965_s5 + $0x20] sm:$0xff] %v604_v9  ;;  %652 = vst [vmem:[%s965_s5 + $0xa0] sm:$0xff] %v620_v10  ;;  %vm559_vm14 = vcmp.gt.f32.partialorder %v501_v6, 0.0  ;;  %v591_v14 = vmul.f32 0.2, %v501_v6  ;;  %vm541_vm15 = vcmp.gt.f32.partialorder %v429_v11, 0.0 }
  0xfa   : > { %v573_v15 = vmul.f32 0.2, %v429_v11  ;;  %vm557_vm0 = vcmp.gt.f32.partialorder %v493_v12, 0.0  ;;  %v589_v16 = vmul.f32 0.2, %v493_v12  ;;  %v607_v17 = vsel %vm543_vm13, %v437_v5, %v575_v13  ;;  %v806_v19 = vpop.f32.mrb[8].mxu0 }
  0xfb   : > { %v623_v18 = vsel %vm559_vm14, %v501_v6, %v591_v14  ;;  %v822_v21 = vpop.f32.mrb[8].mxu1  ;;  %639 = vst [vmem:[%s965_s5 + $0x38] sm:$0xff] %v607_v17  ;;  %v450_v24 = vadd.f32 %v806_v19, %v955_v20  ;;  %v441_v26 = vpop.f32.mrb[9].mxu0 }
  0xfc   : > { %655 = vst [vmem:[%s965_s5 + $0xb8] sm:$0xff] %v623_v18  ;;  %v605_v22 = vsel %vm541_vm15, %v429_v11, %v573_v15  ;;  %v621_v23 = vsel %vm557_vm0, %v493_v12, %v589_v16  ;;  %v514_v25 = vadd.f32 %v822_v21, %v955_v20  ;;  %v505_v27 = vpop.f32.mrb[9].mxu1  ;;  %v442_v28 = vadd.f32 %v955_v20, %v441_v26  ;;  %v807_v30 = vpop.f32.mrb[10].mxu0 }
  0xfd   : > { %637 = vst [vmem:[%s965_s5 + $0x28] sm:$0xff] %v605_v22  ;;  %653 = vst [vmem:[%s965_s5 + $0xa8] sm:$0xff] %v621_v23  ;;  %v506_v29 = vadd.f32 %v955_v20, %v505_v27  ;;  %v823_v31 = vpop.f32.mrb[10].mxu1  ;;  %vm546_vm1 = vcmp.gt.f32.partialorder %v450_v24, 0.0  ;;  %v578_v32 = vmul.f32 0.2, %v450_v24  ;;  %v453_v38 = vadd.f32 %v807_v30, %v955_v20 }
  0xfe   : > { %vm562_vm2 = vcmp.gt.f32.partialorder %v514_v25, 0.0  ;;  %v594_v33 = vmul.f32 0.2, %v514_v25  ;;  %vm544_vm3 = vcmp.gt.f32.partialorder %v442_v28, 0.0  ;;  %v576_v34 = vmul.f32 0.2, %v442_v28 }
  0xff   : > { %vm560_vm4 = vcmp.gt.f32.partialorder %v506_v29, 0.0  ;;  %v592_v35 = vmul.f32 0.2, %v506_v29  ;;  %v610_v36 = vsel %vm546_vm1, %v450_v24, %v578_v32  ;;  %v517_v39 = vadd.f32 %v823_v31, %v955_v20  ;;  %v444_v40 = vpop.f32.mrb[11].mxu0  ;;  %v508_v41 = vpop.f32.mrb[11].mxu1 }
 0x100   : > { %v626_v37 = vsel %vm562_vm2, %v514_v25, %v594_v33  ;;  %642 = vst [vmem:[%s965_s5 + $0x50] sm:$0xff] %v610_v36  ;;  %v608_v42 = vsel %vm544_vm3, %v442_v28, %v576_v34  ;;  %v445_v44 = vadd.f32 %v955_v20, %v444_v40  ;;  %v509_v45 = vadd.f32 %v955_v20, %v508_v41 }
 0x101   : > { %658 = vst [vmem:[%s965_s5 + $0xd0] sm:$0xff] %v626_v37  ;;  %v624_v43 = vsel %vm560_vm4, %v506_v29, %v592_v35  ;;  %v810_v46 = vpop.f32.mrb[12].mxu0  ;;  %v826_v47 = vpop.f32.mrb[12].mxu1  ;;  %640 = vst [vmem:[%s965_s5 + $0x40] sm:$0xff] %v608_v42  ;;  %vm547_vm5 = vcmp.gt.f32.partialorder %v453_v38, 0.0  ;;  %vm563_vm6 = vcmp.gt.f32.partialorder %v517_v39, 0.0 }
 0x102   : > { %656 = vst [vmem:[%s965_s5 + $0xc0] sm:$0xff] %v624_v43  ;;  %v579_v48 = vmul.f32 0.2, %v453_v38  ;;  %v595_v49 = vmul.f32 0.2, %v517_v39  ;;  %vm545_vm7 = vcmp.gt.f32.partialorder %v445_v44, 0.0  ;;  %v466_v54 = vadd.f32 %v810_v46, %v955_v20 }
 0x103   : > { %v577_v50 = vmul.f32 0.2, %v445_v44  ;;  %vm561_vm8 = vcmp.gt.f32.partialorder %v509_v45, 0.0  ;;  %v593_v51 = vmul.f32 0.2, %v509_v45  ;;  %v530_v55 = vadd.f32 %v826_v47, %v955_v20  ;;  %v457_v56 = vpop.f32.mrb[13].mxu0 }
 0x104   : > { %v611_v52 = vsel %vm547_vm5, %v453_v38, %v579_v48  ;;  %v627_v53 = vsel %vm563_vm6, %v517_v39, %v595_v49  ;;  %v521_v57 = vpop.f32.mrb[13].mxu1  ;;  %v458_v60 = vadd.f32 %v955_v20, %v457_v56  ;;  %v811_v62 = vpop.f32.mrb[14].mxu0  ;;  %vm550_vm9 = vcmp.gt.f32.partialorder %v466_v54, 0.0 }
 0x105   : > { %643 = vst [vmem:[%s965_s5 + $0x58] sm:$0xff] %v611_v52  ;;  %659 = vst [vmem:[%s965_s5 + $0xd8] sm:$0xff] %v627_v53  ;;  %v609_v58 = vsel %vm545_vm7, %v445_v44, %v577_v50  ;;  %v625_v59 = vsel %vm561_vm8, %v509_v45, %v593_v51  ;;  %v522_v61 = vadd.f32 %v955_v20, %v521_v57  ;;  %v827_v63 = vpop.f32.mrb[14].mxu1  ;;  %v582_v0 = vmul.f32 0.2, %v466_v54  ;;  %v460_v8 = vpop.f32.mrb[15].mxu0 }
 0x106   : > { %641 = vst [vmem:[%s965_s5 + $0x48] sm:$0xff] %v609_v58  ;;  %657 = vst [vmem:[%s965_s5 + $0xc8] sm:$0xff] %v625_v59  ;;  %vm566_vm10 = vcmp.gt.f32.partialorder %v530_v55, 0.0  ;;  %v598_v1 = vmul.f32 0.2, %v530_v55  ;;  %vm548_vm11 = vcmp.gt.f32.partialorder %v458_v60, 0.0  ;;  %v469_v6 = vadd.f32 %v811_v62, %v955_v20 }
 0x107   : > { %v580_v2 = vmul.f32 0.2, %v458_v60  ;;  %vm564_vm12 = vcmp.gt.f32.partialorder %v522_v61, 0.0  ;;  %v596_v3 = vmul.f32 0.2, %v522_v61  ;;  %v614_v4 = vsel %vm550_vm9, %v466_v54, %v582_v0  ;;  %v524_v9 = vpop.f32.mrb[15].mxu1 }
 0x108   : > { %v630_v5 = vsel %vm566_vm10, %v530_v55, %v598_v1  ;;  %v533_v7 = vadd.f32 %v827_v63, %v955_v20  ;;  %646 = vst [vmem:[%s965_s5 + $0x70] sm:$0xff] %v614_v4  ;;  %v461_v12 = vadd.f32 %v955_v20, %v460_v8  ;;  %v525_v13 = vadd.f32 %v955_v20, %v524_v9 }
 0x109   : > { %662 = vst [vmem:[%s965_s5 + $0xf0] sm:$0xff] %v630_v5  ;;  %v612_v10 = vsel %vm548_vm11, %v458_v60, %v580_v2  ;;  %v628_v11 = vsel %vm564_vm12, %v522_v61, %v596_v3  ;;  %vm551_vm13 = vcmp.gt.f32.partialorder %v469_v6, 0.0  ;;  %v583_v14 = vmul.f32 0.2, %v469_v6 }
 0x10a   : > { %644 = vst [vmem:[%s965_s5 + $0x60] sm:$0xff] %v612_v10  ;;  %660 = vst [vmem:[%s965_s5 + $0xe0] sm:$0xff] %v628_v11  ;;  %vm567_vm14 = vcmp.gt.f32.partialorder %v533_v7, 0.0  ;;  %v599_v15 = vmul.f32 0.2, %v533_v7  ;;  %vm549_vm15 = vcmp.gt.f32.partialorder %v461_v12, 0.0 }
 0x10b   : > { %v581_v16 = vmul.f32 0.2, %v461_v12  ;;  %vm565_vm0 = vcmp.gt.f32.partialorder %v525_v13, 0.0  ;;  %v597_v17 = vmul.f32 0.2, %v525_v13  ;;  %v615_v18 = vsel %vm551_vm13, %v469_v6, %v583_v14 }
 0x10c   : > { %v631_v19 = vsel %vm567_vm14, %v533_v7, %v599_v15  ;;  %647 = vst [vmem:[%s965_s5 + $0x78] sm:$0xff] %v615_v18 }
 0x10d   : > { %663 = vst [vmem:[%s965_s5 + $0xf8] sm:$0xff] %v631_v19  ;;  %v613_v21 = vsel %vm549_vm15, %v461_v12, %v581_v16  ;;  %v629_v22 = vsel %vm565_vm0, %v525_v13, %v597_v17 }
 0x10e   : > { %645 = vst [vmem:[%s965_s5 + $0x68] sm:$0xff] %v613_v21  ;;  %661 = vst [vmem:[%s965_s5 + $0xe8] sm:$0xff] %v629_v22 }
 0x10f PF: > { %s13_s12 = sadd.s32 1, %s870_s12  }
 0x110   : > { %p10_p4 = scmp.ge.s32.totalorder %s13_s12, 4  }
 0x112   :  { %12 = sbr.rel (!%p10_p4) target bundleno = 1 (0x1), region = 62 }

// kernel: discriminator_forward.6
= control target key start
LH: loop header
LB: loop body
LE: loop exit
PB: predicated region body
PF: predicated region fallthrough
CT: control target
= control target key end

     0   :  { %s612_s12 = smov 0   ;;  %s680_s0 = inlined_call_operand.vmem [shape: bf16[2,64,128], index: 0, kind: input, shape index: {}]   ;;  %s681_s1 = inlined_call_operand.vmem [shape: bf16[128,128], index: 1, kind: input, shape index: {}]   ;;  %s682_s2 = inlined_call_operand.vmem [shape: f32[1,128], index: 2, kind: input, shape index: {}]   ;;  %s683_s3 = inlined_call_operand.vmem [shape: f32[2,64,128], index: 3, kind: output, shape index: {}]  }
   0x1 LB: > { %s484_s13 = sadd.s32 4294967295, %s590_s12   ;;  %p488_p0 = scmp.ge.s32.totalorder %s590_s12, 1  ;;  %s590_s12 = sphi %s612_s12, %s13_s12  }
   0x2   : > { %p137_p1 = scmp.lt.s32.totalorder %s590_s12, 3 }
   0x4   : > { %p138_p2 = pnand %p488_p0, %p137_p1 }
   0x5   : > { %v570_v0 = vld [vmem:[%s681_s1] sm:$0xff] (!%p138_p2)   ;;  %p161_p3 = scmp.lt.s32.totalorder (!%p138_p2), %s484_s13, 1  ;;  %v571_v1 = vld [vmem:[%s681_s1 + $0x8] sm:$0xff] (!%p138_p2)   ;;  %v572_v2 = vld [vmem:[%s681_s1 + $0x10] sm:$0xff] (!%p138_p2)  }
   0x6   : > { %141 = sbr.rel (%p138_p2) target bundleno = 314 (0x13a), region = 32  ;;  %522 = vmatprep.subr.bf16.mxu0 (!%p138_p2), %v570_v0  ;;  %546 = vmatprep.subr.bf16.mxu1 (!%p138_p2), %v570_v0  ;;  %v573_v3 = vld [vmem:[%s681_s1 + $0x18] sm:$0xff] (!%p138_p2)   ;;  %v574_v6 = vld [vmem:[%s681_s1 + $0x20] sm:$0xff] (!%p138_p2)   ;;  %v575_v7 = vld [vmem:[%s681_s1 + $0x28] sm:$0xff] (!%p138_p2)  }
   0x7   : > { %523 = vmatpush3.bf16.msra.mxu0 (!%p138_p2), %v570_v0  ;;  %554 = vmatpush3.bf16.msra.mxu1 (!%p138_p2), %v570_v0  ;;  %v576_v8 = vld [vmem:[%s681_s1 + $0x30] sm:$0xff] (!%p138_p2)   ;;  %v577_v9 = vld [vmem:[%s681_s1 + $0x38] sm:$0xff] (!%p138_p2)   ;;  %v493_v12 = vld [vmem:[%s682_s2] ss:$0 sm:$0xff] (!%p138_p2) }
   0x8   : > { %524 = vmatprep.subr.bf16.mxu0 (!%p138_p2), %v571_v1  ;;  %547 = vmatprep.subr.bf16.mxu1 (!%p138_p2), %v571_v1 }
   0xb   : > { %525 = vmatpush3.bf16.msra.mxu0 (!%p138_p2), %v571_v1  ;;  %555 = vmatpush3.bf16.msra.mxu1 (!%p138_p2), %v571_v1 }
   0xc   : > { %526 = vmatprep.subr.bf16.mxu0 (!%p138_p2), %v572_v2  ;;  %548 = vmatprep.subr.bf16.mxu1 (!%p138_p2), %v572_v2 }
   0xd   : > { %s685_s13 = smov (!%p161_p3, %s484_s13), 1 }
   0xe   : > { %s508_s20 = sshll.u32 %s685_s13, 5  ;;  %s509_s9 = sshll.u32 %s685_s13, 6 }
   0xf   : > { %s635_s23 = scalar_lea.vmem %s680_s0, %s508_s20  ;;  %527 = vmatpush3.bf16.msra.mxu0 %v572_v2  ;;  %556 = vmatpush3.bf16.msra.mxu1 %v572_v2  ;;  %s170_s14 = scalar_lea.vmem %s683_s3, %s509_s9 }
  0x10   : > { %v578_v4 = vld [vmem:[%s635_s23] sm:$0xff]   ;;  %v580_v5 = vld [vmem:[%s635_s23 + $0x10] sm:$0xff]   ;;  %528 = vmatprep.subr.bf16.mxu0 %v573_v3  ;;  %549 = vmatprep.subr.bf16.mxu1 %v573_v3  ;;  %v579_v10 = vld [vmem:[%s635_s23 + $0x8] sm:$0xff]  }
  0x11   : > { %538 = vmatprep.mubr.bf16.mxu0 %v578_v4  ;;  %542 = vmatprep.mubr.bf16.mxu1 %v580_v5  ;;  %v581_v11 = vld [vmem:[%s635_s23 + $0x18] sm:$0xff]  }
  0x13   : > { %529 = vmatpush3.bf16.msra.mxu0 %v573_v3  ;;  %557 = vmatpush3.bf16.msra.mxu1 %v573_v3 }
  0x14   : > { %530 = vmatprep.subr.bf16.mxu0 %v574_v6  ;;  %550 = vmatprep.subr.bf16.mxu1 %v574_v6 }
  0x17   : > { %531 = vmatpush3.bf16.msra.mxu0 %v574_v6  ;;  %558 = vmatpush3.bf16.msra.mxu1 %v574_v6 }
  0x18   : > { %532 = vmatprep.subr.bf16.mxu0 %v575_v7  ;;  %551 = vmatprep.subr.bf16.mxu1 %v575_v7 }
  0x1b   : > { %533 = vmatpush3.bf16.msra.mxu0 %v575_v7  ;;  %559 = vmatpush3.bf16.msra.mxu1 %v575_v7 }
  0x1c   : > { %534 = vmatprep.subr.bf16.mxu0 %v576_v8  ;;  %552 = vmatprep.subr.bf16.mxu1 %v576_v8 }
  0x1f   : > { %535 = vmatpush3.bf16.msra.mxu0 %v576_v8  ;;  %560 = vmatpush3.bf16.msra.mxu1 %v576_v8 }
  0x20   : > { %536 = vmatprep.subr.bf16.mxu0 %v577_v9  ;;  %553 = vmatprep.subr.bf16.mxu1 %v577_v9 }
  0x23   : > { %537 = vmatpush3.bf16.msra.mxu0 %v577_v9  ;;  %561 = vmatpush3.bf16.msra.mxu1 %v577_v9 }
  0x26   : > { %539 = vmatmul.mubr.bf16.vlgmr.msra.gmra.mrb[0].mxu0 %v579_v10  ;;  %543 = vmatmul.mubr.bf16.vlgmr.msra.gmra.mrb[0].mxu1 %v581_v11 }
  0xf9   : > { %v540_v13 = vpop.f32.mrb[0].mxu0  ;;  %v544_v14 = vpop.f32.mrb[0].mxu1 }
  0xfa   : > { %v309_v15 = vpop.f32.mrb[1].mxu0  ;;  %v325_v16 = vpop.f32.mrb[1].mxu1  ;;  %v318_v22 = vadd.f32 %v540_v13, %v493_v12  ;;  %v334_v37 = vadd.f32 %v544_v14, %v493_v12 }
  0xfb   : > { %v659_v17 = vadd.f32 %v493_v12, %v309_v15  ;;  %v541_v18 = vpop.f32.mrb[2].mxu0  ;;  %v545_v19 = vpop.f32.mrb[2].mxu1  ;;  %v326_v24 = vadd.f32 %v493_v12, %v325_v16 }
  0xfc   : > { %v312_v20 = vpop.f32.mrb[3].mxu0  ;;  %v328_v21 = vpop.f32.mrb[3].mxu1  ;;  %v321_v26 = vadd.f32 %v541_v18, %v493_v12  ;;  %v355_v29 = vmul.f32 %v318_v22, %v318_v22  ;;  %v337_v41 = vadd.f32 %v545_v19, %v493_v12  ;;  %v359_v44 = vmul.f32 %v334_v37, %v334_v37 }
  0xfd   : > { %v313_v23 = vadd.f32 %v493_v12, %v312_v20  ;;  %v353_v25 = vmul.f32 %v659_v17, %v659_v17  ;;  %v357_v32 = vmul.f32 %v326_v24, %v326_v24  ;;  %v329_v36 = vadd.f32 %v493_v12, %v328_v21 }
  0xfe   : > { %v356_v33 = vmul.f32 %v321_v26, %v321_v26  ;;  %v360_v47 = vmul.f32 %v337_v41, %v337_v41 }
  0xff   : > { %v340_v27 = vadd.f32 %v313_v23, %v659_v17  ;;  %v354_v28 = vmul.f32 %v313_v23, %v313_v23  ;;  %v358_v43 = vmul.f32 %v329_v36, %v329_v36 }
 0x101   : > { %v341_v30 = vadd.f32 %v340_v27, %v318_v22  ;;  %v361_v31 = vadd.f32 %v354_v28, %v353_v25 }
 0x103   : > { %v362_v34 = vadd.f32 %v361_v31, %v355_v29  ;;  %v342_v35 = vadd.f32 %v341_v30, %v321_v26 }
 0x105   : > { %v343_v38 = vadd.f32 %v342_v35, %v326_v24  ;;  %v363_v39 = vadd.f32 %v362_v34, %v356_v33 }
 0x107   : > { %v364_v40 = vadd.f32 %v363_v39, %v357_v32  ;;  %v344_v42 = vadd.f32 %v343_v38, %v329_v36 }
 0x109   : > { %v345_v45 = vadd.f32 %v344_v42, %v334_v37  ;;  %v365_v46 = vadd.f32 %v364_v40, %v358_v43 }
 0x10b   : > { %v346_v48 = vadd.f32 %v345_v45, %v337_v41  ;;  %v366_v49 = vadd.f32 %v365_v46, %v359_v44 }
 0x10d   : > { %v347_v50 = vrot.slane %v346_v48, 4  ;;  %v367_v51 = vadd.f32 %v366_v49, %v360_v47 }
 0x10f   : > { %v348_v52 = vadd.f32 %v347_v50, %v346_v48  ;;  %v368_v53 = vrot.slane %v367_v51, 4 }
 0x111   : > { %v349_v54 = vrot.slane %v348_v52, 2  ;;  %v369_v55 = vadd.f32 %v368_v53, %v367_v51 }
 0x113   : > { %v350_v56 = vadd.f32 %v349_v54, %v348_v52  ;;  %v370_v57 = vrot.slane %v369_v55, 2 }
 0x115   : > { %v351_v58 = vrot.slane %v350_v56, 1  ;;  %v371_v59 = vadd.f32 %v370_v57, %v369_v55 }
 0x117   : > { %v352_v60 = vadd.f32 %v351_v58, %v350_v56  ;;  %v372_v61 = vrot.slane %v371_v59, 1 }
 0x119   : > { %v373_v62 = vadd.f32 %v372_v61, %v371_v59  ;;  %v374_v63 = vmul.f32 0.015625, %v352_v60 }
 0x11b   : > { %v375_v0 = vmul.f32 0.015625, %v373_v62  ;;  %v376_v1 = vmul.f32 %v374_v63, %v374_v63  ;;  %v379_v2 = vsub.f32 %v659_v17, %v374_v63  ;;  %v380_v3 = vsub.f32 %v313_v23, %v374_v63 }
 0x11c   : > { %v381_v4 = vsub.f32 %v318_v22, %v374_v63  ;;  %v382_v5 = vsub.f32 %v321_v26, %v374_v63  ;;  %v383_v6 = vsub.f32 %v326_v24, %v374_v63  ;;  %v384_v7 = vsub.f32 %v329_v36, %v374_v63 }
 0x11d   : > { %v377_v8 = vsub.f32 %v375_v0, %v376_v1  ;;  %v385_v9 = vsub.f32 %v334_v37, %v374_v63  ;;  %v386_v10 = vsub.f32 %v337_v41, %v374_v63 }
 0x11f   : > { %v378_v11 = vmax.f32 %v377_v8, 0.0 }
 0x121   : > { %v387_v12 = vadd.f32 1e-05, %v378_v11 }
 0x123   : > { %582 = vrsqrt.f32 %v387_v12 }
 0x12d   : > { %v583_v13 = vpop.eup %582 }
 0x12e   : > { %v389_v14 = vmul.f32 %v583_v13, %v379_v2  ;;  %v390_v15 = vmul.f32 %v583_v13, %v380_v3  ;;  %v391_v16 = vmul.f32 %v583_v13, %v381_v4  ;;  %v392_v18 = vmul.f32 %v583_v13, %v382_v5 }
 0x12f   : > { %v393_v19 = vmul.f32 %v583_v13, %v383_v6  ;;  %v394_v17 = vmul.f32 %v583_v13, %v384_v7  ;;  %v395_v20 = vmul.f32 %v583_v13, %v385_v9  ;;  %v396_v21 = vmul.f32 %v583_v13, %v386_v10 }
 0x130   : > { %vm397_vm0 = vcmp.gt.f32.partialorder %v389_v14, 0.0  ;;  %vm398_vm1 = vcmp.gt.f32.partialorder %v390_v15, 0.0  ;;  %vm399_vm2 = vcmp.gt.f32.partialorder %v391_v16, 0.0  ;;  %vm400_vm3 = vcmp.gt.f32.partialorder %v392_v18, 0.0 }
 0x131   : > { %vm401_vm4 = vcmp.gt.f32.partialorder %v393_v19, 0.0  ;;  %vm402_vm5 = vcmp.gt.f32.partialorder %v394_v17, 0.0  ;;  %vm403_vm6 = vcmp.gt.f32.partialorder %v395_v20, 0.0  ;;  %vm404_vm7 = vcmp.gt.f32.partialorder %v396_v21, 0.0 }
 0x132   : > { %v405_v22 = vmul.f32 0.2, %v389_v14  ;;  %v406_v23 = vmul.f32 0.2, %v390_v15  ;;  %v407_v24 = vmul.f32 0.2, %v391_v16 }
 0x133   : > { %v408_v25 = vmul.f32 0.2, %v392_v18  ;;  %v409_v26 = vmul.f32 0.2, %v393_v19  ;;  %v410_v27 = vmul.f32 0.2, %v394_v17 }
 0x134   : > { %v411_v28 = vmul.f32 0.2, %v395_v20  ;;  %v412_v29 = vmul.f32 0.2, %v396_v21  ;;  %v413_v30 = vsel %vm397_vm0, %v389_v14, %v405_v22  ;;  %v414_v31 = vsel %vm398_vm1, %v390_v15, %v406_v23 }
 0x135   : > { %v415_v32 = vsel %vm399_vm2, %v391_v16, %v407_v24  ;;  %v416_v33 = vsel %vm400_vm3, %v392_v18, %v408_v25  ;;  %v417_v34 = vsel %vm401_vm4, %v393_v19, %v409_v26  ;;  %v418_v35 = vsel %vm402_vm5, %v394_v17, %v410_v27  ;;  %421 = vst [vmem:[%s170_s14] sm:$0xff] %v413_v30 }
 0x136   : > { %422 = vst [vmem:[%s170_s14 + $0x8] sm:$0xff] %v414_v31  ;;  %v419_v36 = vsel %vm403_vm6, %v395_v20, %v411_v28  ;;  %v420_v37 = vsel %vm404_vm7, %v396_v21, %v412_v29  ;;  %423 = vst [vmem:[%s170_s14 + $0x10] sm:$0xff] %v415_v32 }
 0x137   : > { %424 = vst [vmem:[%s170_s14 + $0x18] sm:$0xff] %v416_v33  ;;  %425 = vst [vmem:[%s170_s14 + $0x20] sm:$0xff] %v417_v34 }
 0x138   : > { %426 = vst [vmem:[%s170_s14 + $0x28] sm:$0xff] %v418_v35  ;;  %427 = vst [vmem:[%s170_s14 + $0x30] sm:$0xff] %v419_v36 }
 0x139   : > { %428 = vst [vmem:[%s170_s14 + $0x38] sm:$0xff] %v420_v37 }
 0x13a PF: > { %s13_s12 = sadd.s32 1, %s590_s12  }
 0x13b   : > { %p10_p4 = scmp.ge.s32.totalorder %s13_s12, 4  }
 0x13d   :  { %12 = sbr.rel (!%p10_p4) target bundleno = 1 (0x1), region = 62 }

// kernel: discriminator_forward.7
= control target key start
LH: loop header
LB: loop body
LE: loop exit
PB: predicated region body
PF: predicated region fallthrough
CT: control target
= control target key end

     0   :  { %s561_s12 = smov 0   ;;  %s636_s0 = inlined_call_operand.vmem [shape: bf16[2,16,256], index: 0, kind: input, shape index: {}]   ;;  %s637_s1 = inlined_call_operand.vmem [shape: bf16[256,128], index: 1, kind: input, shape index: {}]   ;;  %s638_s2 = inlined_call_operand.vmem [shape: f32[1,128], index: 2, kind: input, shape index: {}]   ;;  %s639_s3 = inlined_call_operand.vmem [shape: f32[2,16,128], index: 3, kind: output, shape index: {}]  }
   0x1 LB: > { %s450_s13 = sadd.s32 4294967295, %s539_s12   ;;  %p454_p0 = scmp.ge.s32.totalorder %s539_s12, 1  ;;  %s539_s12 = sphi %s561_s12, %s13_s12  }
   0x2   : > { %p137_p1 = scmp.lt.s32.totalorder %s539_s12, 3 }
   0x4   : > { %p138_p2 = pnand %p454_p0, %p137_p1 }
   0x5   : > { %v512_v0 = vld [vmem:[%s637_s1 + $0x40] sm:$0xff] (!%p138_p2)   ;;  %v514_v2 = vld [vmem:[%s637_s1 + $0x48] sm:$0xff] (!%p138_p2)   ;;  %p161_p3 = scmp.lt.s32.totalorder (!%p138_p2), %s450_s13, 1  ;;  %v516_v4 = vld [vmem:[%s637_s1 + $0x50] sm:$0xff] (!%p138_p2)  }
   0x6   : > { %141 = sbr.rel (%p138_p2) target bundleno = 298 (0x12a), region = 32  ;;  %v513_v1 = vld [vmem:[%s637_s1] sm:$0xff] (!%p138_p2)   ;;  %482 = vmatprep.subr.bf16.mxu0 (!%p138_p2), %v512_v0  ;;  %v515_v3 = vld [vmem:[%s637_s1 + $0x8] sm:$0xff] (!%p138_p2)   ;;  %v517_v5 = vld [vmem:[%s637_s1 + $0x10] sm:$0xff] (!%p138_p2)  }
   0x7   : > { %483 = vmatpush3.bf16.msra.mxu0 (!%p138_p2), %v513_v1  ;;  %v518_v6 = vld [vmem:[%s637_s1 + $0x58] sm:$0xff] (!%p138_p2)   ;;  %v520_v8 = vld [vmem:[%s637_s1 + $0x60] sm:$0xff] (!%p138_p2)   ;;  %v522_v10 = vld [vmem:[%s637_s1 + $0x68] sm:$0xff] (!%p138_p2)  }
   0x8   : > { %484 = vmatprep.subr.bf16.mxu0 (!%p138_p2), %v514_v2  ;;  %v519_v7 = vld [vmem:[%s637_s1 + $0x18] sm:$0xff] (!%p138_p2)   ;;  %v521_v9 = vld [vmem:[%s637_s1 + $0x20] sm:$0xff] (!%p138_p2)   ;;  %v523_v12 = vld [vmem:[%s637_s1 + $0x28] sm:$0xff] (!%p138_p2)  }
   0x9   : > { %v524_v13 = vld [vmem:[%s637_s1 + $0x70] sm:$0xff] (!%p138_p2)   ;;  %v526_v15 = vld [vmem:[%s637_s1 + $0x78] sm:$0xff] (!%p138_p2)   ;;  %v459_v19 = vld [vmem:[%s638_s2] ss:$0 sm:$0xff] (!%p138_p2) }
   0xa   : > { %v525_v14 = vld [vmem:[%s637_s1 + $0x30] sm:$0xff] (!%p138_p2)   ;;  %v527_v16 = vld [vmem:[%s637_s1 + $0x38] sm:$0xff] (!%p138_p2)  }
   0xb   : > { %485 = vmatpush3.bf16.msra.mxu0 (!%p138_p2), %v515_v3 }
   0xc   : > { %486 = vmatprep.subr.bf16.mxu0 (!%p138_p2), %v516_v4 }
   0xd   : > { %s641_s13 = smov (!%p161_p3, %s450_s13), 1 }
   0xe   : > { %s480_s30 = sshll.u32 %s641_s13, 4 }
   0xf   : > { %487 = vmatpush3.bf16.msra.mxu0 %v517_v5  ;;  %s165_s8 = scalar_lea.vmem %s636_s0, %s480_s30  ;;  %s170_s29 = scalar_lea.vmem %s639_s3, %s480_s30 }
  0x10   : > { %488 = vmatprep.subr.bf16.mxu0 %v518_v6  ;;  %v530_v11 = vld [vmem:[%s165_s8 + $0x4] ss:$8 sps:$4 sm:$0xff]   ;;  %v528_v17 = vld [vmem:[%s165_s8] ss:$8 sps:$4 sm:$0xff]  }
  0x11   : > { %351 = vmatprep.mubr.bf16.mxu0 %v530_v11 }
  0x13   : > { %489 = vmatpush3.bf16.msra.mxu0 %v519_v7 }
  0x14   : > { %490 = vmatprep.subr.bf16.mxu0 %v520_v8 }
  0x17   : > { %491 = vmatpush3.bf16.msra.mxu0 %v521_v9 }
  0x18   : > { %492 = vmatprep.subr.bf16.mxu0 %v522_v10 }
  0x1b   : > { %493 = vmatpush3.bf16.msra.mxu0 %v523_v12 }
  0x1c   : > { %494 = vmatprep.subr.bf16.mxu0 %v524_v13 }
  0x1f   : > { %495 = vmatpush3.bf16.msra.mxu0 %v525_v14 }
  0x20   : > { %496 = vmatprep.subr.bf16.mxu0 %v526_v15 }
  0x23   : > { %497 = vmatpush3.bf16.msra.mxu0 %v527_v16 }
  0x26   : > { %352 = vmatmul.mubr.bf16.vlgmr.msra.gmra.mrb[0].mxu0 %v528_v17 }
  0xf9   : > { %v498_v18 = vpop.f32.mrb[0].mxu0 }
  0xfa   : > { %v499_v20 = vpop.f32.mrb[1].mxu0 }
  0xfb   : > { %v500_v21 = vadd.f32 %v499_v20, %v498_v18  ;;  %v501_v22 = vpop.f32.mrb[2].mxu0 }
  0xfc   : > { %v502_v23 = vpop.f32.mrb[3].mxu0 }
  0xfd   : > { %v354_v24 = vadd.f32 %v500_v21, %v459_v19  ;;  %v503_v25 = vadd.f32 %v502_v23, %v501_v22 }
  0xff   : > { %v357_v26 = vadd.f32 %v503_v25, %v459_v19  ;;  %v367_v27 = vmul.f32 %v354_v24, %v354_v24 }
 0x101   : > { %v360_v28 = vadd.f32 %v357_v26, %v354_v24  ;;  %v368_v29 = vmul.f32 %v357_v26, %v357_v26 }
 0x103   : > { %v361_v30 = vrot.slane %v360_v28, 4  ;;  %v369_v31 = vadd.f32 %v368_v29, %v367_v27 }
 0x105   : > { %v362_v32 = vadd.f32 %v361_v30, %v360_v28  ;;  %v370_v33 = vrot.slane %v369_v31, 4 }
 0x107   : > { %v363_v34 = vrot.slane %v362_v32, 2  ;;  %v371_v35 = vadd.f32 %v370_v33, %v369_v31 }
 0x109   : > { %v364_v36 = vadd.f32 %v363_v34, %v362_v32  ;;  %v372_v37 = vrot.slane %v371_v35, 2 }
 0x10b   : > { %v365_v38 = vrot.slane %v364_v36, 1  ;;  %v373_v39 = vadd.f32 %v372_v37, %v371_v35 }
 0x10d   : > { %v366_v40 = vadd.f32 %v365_v38, %v364_v36  ;;  %v374_v41 = vrot.slane %v373_v39, 1 }
 0x10f   : > { %v375_v42 = vadd.f32 %v374_v41, %v373_v39  ;;  %v376_v43 = vmul.f32 0.0625, %v366_v40 }
 0x111   : > { %v377_v44 = vmul.f32 0.0625, %v375_v42  ;;  %v378_v45 = vmul.f32 %v376_v43, %v376_v43  ;;  %v381_v46 = vsub.f32 %v354_v24, %v376_v43  ;;  %v382_v47 = vsub.f32 %v357_v26, %v376_v43 }
 0x113   : > { %v379_v48 = vsub.f32 %v377_v44, %v378_v45 }
 0x115   : > { %v380_v49 = vmax.f32 %v379_v48, 0.0 }
 0x117   : > { %v383_v50 = vadd.f32 1e-05, %v380_v49 }
 0x119   : > { %531 = vrsqrt.f32 %v383_v50 }
 0x123   : > { %v532_v51 = vpop.eup %531 }
 0x124   : > { %v385_v52 = vmul.f32 %v532_v51, %v381_v46  ;;  %v386_v53 = vmul.f32 %v532_v51, %v382_v47 }
 0x126   : > { %vm387_vm0 = vcmp.gt.f32.partialorder %v385_v52, 0.0  ;;  %vm388_vm1 = vcmp.gt.f32.partialorder %v386_v53, 0.0  ;;  %v389_v54 = vmul.f32 0.2, %v385_v52  ;;  %v390_v55 = vmul.f32 0.2, %v386_v53 }
 0x128   : > { %v391_v56 = vsel %vm387_vm0, %v385_v52, %v389_v54  ;;  %v392_v57 = vsel %vm388_vm1, %v386_v53, %v390_v55 }
 0x129   : > { %393 = vst [vmem:[%s170_s29] sm:$0xff] %v391_v56  ;;  %394 = vst [vmem:[%s170_s29 + $0x8] sm:$0xff] %v392_v57 }
 0x12a PF: > { %s13_s12 = sadd.s32 1, %s539_s12  }
 0x12b   : > { %p10_p4 = scmp.ge.s32.totalorder %s13_s12, 4  }
 0x12d   :  { %12 = sbr.rel (!%p10_p4) target bundleno = 1 (0x1), region = 62 }

// kernel: discriminator_forward.8
= control target key start
LH: loop header
LB: loop body
LE: loop exit
PB: predicated region body
PF: predicated region fallthrough
CT: control target
= control target key end

     0   :  { %s804_s12 = smov 0   ;;  %s928_s0 = inlined_call_operand.vmem [shape: bf16[2,9,512], index: 0, kind: input, shape index: {}]   ;;  %s929_s1 = inlined_call_operand.vmem [shape: bf16[512,128], index: 1, kind: input, shape index: {}]   ;;  %s930_s2 = inlined_call_operand.vmem [shape: f32[1,128], index: 2, kind: input, shape index: {}]   ;;  %s931_s3 = inlined_call_operand.vmem [shape: f32[2,9,128], index: 3, kind: output, shape index: {}]  }
   0x1 LB: > { %s634_s13 = sadd.s32 4294967295, %s782_s12   ;;  %p638_p0 = scmp.ge.s32.totalorder %s782_s12, 1  ;;  %s782_s12 = sphi %s804_s12, %s13_s12  }
   0x2   : > { %p137_p1 = scmp.lt.s32.totalorder %s782_s12, 3 }
   0x4   : > { %p138_p2 = pnand %p638_p0, %p137_p1 }
   0x5   : > { %v736_v0 = vld [vmem:[%s929_s1 + $0x40] sm:$0xff] (!%p138_p2)   ;;  %v740_v4 = vld [vmem:[%s929_s1 + $0x48] sm:$0xff] (!%p138_p2)   ;;  %v744_v8 = vld [vmem:[%s929_s1 + $0x50] sm:$0xff] (!%p138_p2)   ;;  %p161_p3 = scmp.lt.s32.totalorder (!%p138_p2), %s634_s13, 1  ;;  %vm541_vm0 = vcmask (!%p138_p2), 1040384  }
   0x6   : > { %141 = sbr.rel (%p138_p2) target bundleno = 302 (0x12e), region = 32  ;;  %v737_v1 = vld [vmem:[%s929_s1 + $0xc0] sm:$0xff] (!%p138_p2)   ;;  %684 = vmatprep.subr.bf16.mxu0 (!%p138_p2), %v736_v0  ;;  %v741_v5 = vld [vmem:[%s929_s1 + $0xc8] sm:$0xff] (!%p138_p2)   ;;  %v745_v9 = vld [vmem:[%s929_s1 + $0xd0] sm:$0xff] (!%p138_p2)  }
   0x7   : > { %v738_v2 = vld [vmem:[%s929_s1] sm:$0xff] (!%p138_p2)   ;;  %706 = vmatprep.subr.bf16.mxu1 (!%p138_p2), %v737_v1  ;;  %v742_v6 = vld [vmem:[%s929_s1 + $0x8] sm:$0xff] (!%p138_p2)   ;;  %v746_v10 = vld [vmem:[%s929_s1 + $0x10] sm:$0xff] (!%p138_p2)  }
   0x8   : > { %v739_v3 = vld [vmem:[%s929_s1 + $0x80] sm:$0xff] (!%p138_p2)   ;;  %685 = vmatpush3.bf16.msra.mxu0 (!%p138_p2), %v738_v2  ;;  %v743_v7 = vld [vmem:[%s929_s1 + $0x88] sm:$0xff] (!%p138_p2)   ;;  %v747_v11 = vld [vmem:[%s929_s1 + $0x90] sm:$0xff] (!%p138_p2)  }
   0x9   : > { %707 = vmatpush3.bf16.msra.mxu1 (!%p138_p2), %v739_v3  ;;  %686 = vmatprep.subr.bf16.mxu0 (!%p138_p2), %v740_v4  ;;  %v748_v12 = vld [vmem:[%s929_s1 + $0x58] sm:$0xff] (!%p138_p2)   ;;  %v752_v16 = vld [vmem:[%s929_s1 + $0x60] sm:$0xff] (!%p138_p2)   ;;  %v756_v20 = vld [vmem:[%s929_s1 + $0x68] sm:$0xff] (!%p138_p2)  }
   0xa   : > { %708 = vmatprep.subr.bf16.mxu1 (!%p138_p2), %v741_v5  ;;  %v749_v13 = vld [vmem:[%s929_s1 + $0xd8] sm:$0xff] (!%p138_p2)   ;;  %v753_v17 = vld [vmem:[%s929_s1 + $0xe0] sm:$0xff] (!%p138_p2)   ;;  %v757_v21 = vld [vmem:[%s929_s1 + $0xe8] sm:$0xff] (!%p138_p2)  }
   0xb   : > { %v750_v14 = vld [vmem:[%s929_s1 + $0x18] sm:$0xff] (!%p138_p2)   ;;  %v754_v18 = vld [vmem:[%s929_s1 + $0x20] sm:$0xff] (!%p138_p2)   ;;  %v758_v22 = vld [vmem:[%s929_s1 + $0x28] sm:$0xff] (!%p138_p2)  }
   0xc   : > { %687 = vmatpush3.bf16.msra.mxu0 (!%p138_p2), %v742_v6  ;;  %v751_v15 = vld [vmem:[%s929_s1 + $0x98] sm:$0xff] (!%p138_p2)   ;;  %v755_v19 = vld [vmem:[%s929_s1 + $0xa0] sm:$0xff] (!%p138_p2)   ;;  %v759_v23 = vld [vmem:[%s929_s1 + $0xa8] sm:$0xff] (!%p138_p2)  }
   0xd   : > { %709 = vmatpush3.bf16.msra.mxu1 %v743_v7  ;;  %688 = vmatprep.subr.bf16.mxu0 %v744_v8  ;;  %s933_s13 = smov (!%p161_p3, %s634_s13), 1  ;;  %v760_v24 = vld [vmem:[%s929_s1 + $0x70] sm:$0xff]   ;;  %v764_v28 = vld [vmem:[%s929_s1 + $0x78] sm:$0xff]   ;;  %v643_v38 = vld [vmem:[%s930_s2] ss:$0 sm:$0xff] }
   0xe   : > { %710 = vmatprep.subr.bf16.mxu1 %v745_v9  ;;  %v761_v25 = vld [vmem:[%s929_s1 + $0xf0] sm:$0xff]   ;;  %s682_s18 = sshll.u32 %s933_s13, 5  ;;  %v765_v29 = vld [vmem:[%s929_s1 + $0xf8] sm:$0xff]   ;;  %s683_s7 = sshll.u32 %s933_s13, 4 }
   0xf   : > { %v762_v26 = vld [vmem:[%s929_s1 + $0x30] sm:$0xff]   ;;  %s165_s27 = scalar_lea.vmem %s928_s0, %s682_s18  ;;  %v766_v30 = vld [vmem:[%s929_s1 + $0x38] sm:$0xff]   ;;  %s170_s10 = scalar_lea.vmem %s931_s3, %s683_s7 }
  0x10   : > { %689 = vmatpush3.bf16.msra.mxu0 %v746_v10  ;;  %v763_v27 = vld [vmem:[%s929_s1 + $0xb0] sm:$0xff]   ;;  %v767_v31 = vld [vmem:[%s929_s1 + $0xb8] sm:$0xff]  }
  0x11   : > { %711 = vmatpush3.bf16.msra.mxu1 %v747_v11  ;;  %690 = vmatprep.subr.bf16.mxu0 %v748_v12  ;;  %v768_v32 = vld [vmem:[%s165_s27] ss:$16 sps:$4 sm:$0x1f]   ;;  %v770_v33 = vld [vmem:[%s165_s27 + $0x4] ss:$16 sps:$4 sm:$0x1f]  }
  0x12   : > { %712 = vmatprep.subr.bf16.mxu1 %v749_v13  ;;  %v771_v34 = vld [vmem:[%s165_s27 + $0x8] ss:$16 sps:$4 sm:$0x1f]   ;;  %v773_v35 = vld [vmem:[%s165_s27 + $0xc] ss:$16 sps:$4 sm:$0x1f]   ;;  %491 = vmatprep.mubr.bf16.mxu0 %v770_v33 }
  0x13   : > { %532 = vmatprep.mubr.bf16.mxu1 %v773_v35 }
  0x14   : > { %691 = vmatpush3.bf16.msra.mxu0 %v750_v14 }
  0x15   : > { %713 = vmatpush3.bf16.msra.mxu1 %v751_v15  ;;  %692 = vmatprep.subr.bf16.mxu0 %v752_v16 }
  0x16   : > { %714 = vmatprep.subr.bf16.mxu1 %v753_v17 }
  0x18   : > { %693 = vmatpush3.bf16.msra.mxu0 %v754_v18 }
  0x19   : > { %715 = vmatpush3.bf16.msra.mxu1 %v755_v19  ;;  %694 = vmatprep.subr.bf16.mxu0 %v756_v20 }
  0x1a   : > { %716 = vmatprep.subr.bf16.mxu1 %v757_v21 }
  0x1c   : > { %695 = vmatpush3.bf16.msra.mxu0 %v758_v22 }
  0x1d   : > { %717 = vmatpush3.bf16.msra.mxu1 %v759_v23  ;;  %696 = vmatprep.subr.bf16.mxu0 %v760_v24 }
  0x1e   : > { %718 = vmatprep.subr.bf16.mxu1 %v761_v25 }
  0x20   : > { %697 = vmatpush3.bf16.msra.mxu0 %v762_v26 }
  0x21   : > { %719 = vmatpush3.bf16.msra.mxu1 %v763_v27  ;;  %698 = vmatprep.subr.bf16.mxu0 %v764_v28 }
  0x22   : > { %720 = vmatprep.subr.bf16.mxu1 %v765_v29 }
  0x24   : > { %699 = vmatpush3.bf16.msra.mxu0 %v766_v30 }
  0x25   : > { %721 = vmatpush3.bf16.msra.mxu1 %v767_v31 }
  0x27   : > { %492 = vmatmul.mubr.bf16.vlgmr.msra.gmra.mrb[0].mxu0 %v768_v32 }
  0x28   : > { %533 = vmatmul.mubr.bf16.vlgmr.msra.gmra.mrb[0].mxu1 %v771_v34 }
  0xfa   : > { %v700_v36 = vpop.f32.mrb[0].mxu0 }
  0xfb   : > { %v722_v37 = vpop.f32.mrb[0].mxu1  ;;  %v701_v39 = vpop.f32.mrb[1].mxu0 }
  0xfc   : > { %v702_v40 = vadd.f32 %v701_v39, %v700_v36  ;;  %v723_v41 = vpop.f32.mrb[1].mxu1  ;;  %v703_v42 = vpop.f32.mrb[2].mxu0 }
  0xfd   : > { %v724_v43 = vadd.f32 %v723_v41, %v722_v37  ;;  %v725_v44 = vpop.f32.mrb[2].mxu1  ;;  %v704_v45 = vpop.f32.mrb[3].mxu0 }
  0xfe   : > { %v494_v46 = vadd.f32 %v702_v40, %v643_v38  ;;  %v705_v47 = vadd.f32 %v704_v45, %v703_v42  ;;  %v726_v48 = vpop.f32.mrb[3].mxu1 }
  0xff   : > { %v727_v49 = vadd.f32 %v726_v48, %v725_v44 }
 0x100   : > { %v535_v50 = vadd.f32 %v724_v43, %v494_v46  ;;  %v497_v51 = vadd.f32 %v705_v47, %v643_v38 }
 0x102   : > { %v538_v52 = vadd.f32 %v727_v49, %v497_v51  ;;  %v550_v55 = vmul.f32 %v535_v50, %v535_v50 }
 0x104   : > { %v542_v53 = vsel %vm541_vm0, %v538_v52, 0.0  ;;  %v551_v54 = vmul.f32 %v538_v52, %v538_v52 }
 0x105   : > { %v543_v56 = vadd.f32 %v542_v53, %v535_v50 }
 0x106   : > { %v552_v57 = vsel %vm541_vm0, %v551_v54, 0.0 }
 0x107   : > { %v544_v58 = vrot.slane %v543_v56, 4  ;;  %v553_v59 = vadd.f32 %v552_v57, %v550_v55 }
 0x109   : > { %v545_v60 = vadd.f32 %v544_v58, %v543_v56  ;;  %v554_v61 = vrot.slane %v553_v59, 4 }
 0x10b   : > { %v546_v62 = vrot.slane %v545_v60, 2  ;;  %v555_v63 = vadd.f32 %v554_v61, %v553_v59 }
 0x10d   : > { %v547_v0 = vadd.f32 %v546_v62, %v545_v60  ;;  %v556_v1 = vrot.slane %v555_v63, 2 }
 0x10f   : > { %v548_v2 = vrot.slane %v547_v0, 1  ;;  %v557_v3 = vadd.f32 %v556_v1, %v555_v63 }
 0x111   : > { %v549_v4 = vadd.f32 %v548_v2, %v547_v0  ;;  %v558_v5 = vrot.slane %v557_v3, 1 }
 0x113   : > { %v559_v6 = vadd.f32 %v558_v5, %v557_v3  ;;  %v560_v7 = vmul.f32 0.11111111, %v549_v4 }
 0x115   : > { %v561_v8 = vmul.f32 0.11111111, %v559_v6  ;;  %v562_v9 = vmul.f32 %v560_v7, %v560_v7  ;;  %v565_v10 = vsub.f32 %v535_v50, %v560_v7  ;;  %v566_v11 = vsub.f32 %v538_v52, %v560_v7 }
 0x117   : > { %v563_v12 = vsub.f32 %v561_v8, %v562_v9 }
 0x119   : > { %v564_v13 = vmax.f32 %v563_v12, 0.0 }
 0x11b   : > { %v567_v14 = vadd.f32 1e-05, %v564_v13 }
 0x11d   : > { %774 = vrsqrt.f32 %v567_v14 }
 0x127   : > { %v775_v15 = vpop.eup %774 }
 0x128   : > { %v569_v16 = vmul.f32 %v775_v15, %v565_v10  ;;  %v570_v17 = vmul.f32 %v775_v15, %v566_v11 }
 0x12a   : > { %vm571_vm1 = vcmp.gt.f32.partialorder %v569_v16, 0.0  ;;  %vm572_vm2 = vcmp.gt.f32.partialorder %v570_v17, 0.0  ;;  %v573_v18 = vmul.f32 0.2, %v569_v16  ;;  %v574_v19 = vmul.f32 0.2, %v570_v17 }
 0x12c   : > { %v575_v20 = vsel %vm571_vm1, %v569_v16, %v573_v18  ;;  %v576_v21 = vsel %vm572_vm2, %v570_v17, %v574_v19 }
 0x12d   : > { %577 = vst [vmem:[%s170_s10] sm:$0xff] %v575_v20  ;;  %578 = vst [vmem:[%s170_s10 + $0x8] sm:$0x1] %v576_v21 }
 0x12e PF: > { %s13_s12 = sadd.s32 1, %s782_s12  }
 0x12f   : > { %p10_p4 = scmp.ge.s32.totalorder %s13_s12, 4  }
 0x131   :  { %12 = sbr.rel (!%p10_p4) target bundleno = 1 (0x1), region = 62 }

// kernel: discriminator_forward.9
= control target key start
LH: loop header
LB: loop body
LE: loop exit
PB: predicated region body
PF: predicated region fallthrough
CT: control target
= control target key end

     0   :  { %s1194_s1 = inlined_call_operand.vmem [shape: bf16[1024,128], index: 1, kind: input, shape index: {}]   ;;  %s1195_s0 = inlined_call_operand.vmem [shape: bf16[8,1024], index: 0, kind: input, shape index: {}]   ;;  %s1196_s2 = inlined_call_operand.vmem [shape: f32[1,128], index: 2, kind: input, shape index: {}]   ;;  %s1197_s3 = inlined_call_operand.vmem [shape: f32[8,128], index: 3, kind: output, shape index: {}]  }
   0x1   :  { %v892_v0 = vld [vmem:[%s1194_s1 + $0x40] sm:$0xff]   ;;  %v896_v4 = vld [vmem:[%s1194_s1 + $0x48] sm:$0xff]   ;;  %v900_v8 = vld [vmem:[%s1194_s1 + $0x50] sm:$0xff]  }
   0x2   :  { %v893_v1 = vld [vmem:[%s1194_s1 + $0xc0] sm:$0xff]   ;;  %804 = vmatprep.subr.bf16.mxu0 %v892_v0  ;;  %v897_v5 = vld [vmem:[%s1194_s1 + $0xc8] sm:$0xff]   ;;  %v901_v9 = vld [vmem:[%s1194_s1 + $0xd0] sm:$0xff]  }
   0x3   :  { %v894_v2 = vld [vmem:[%s1194_s1] sm:$0xff]   ;;  %826 = vmatprep.subr.bf16.mxu1 %v893_v1  ;;  %v898_v6 = vld [vmem:[%s1194_s1 + $0x8] sm:$0xff]   ;;  %v902_v10 = vld [vmem:[%s1194_s1 + $0x10] sm:$0xff]  }
   0x4   :  { %v895_v3 = vld [vmem:[%s1194_s1 + $0x80] sm:$0xff]   ;;  %805 = vmatpush3.bf16.msra.mxu0 %v894_v2  ;;  %v899_v7 = vld [vmem:[%s1194_s1 + $0x88] sm:$0xff]   ;;  %v903_v11 = vld [vmem:[%s1194_s1 + $0x90] sm:$0xff]  }
   0x5   :  { %827 = vmatpush3.bf16.msra.mxu1 %v895_v3  ;;  %806 = vmatprep.subr.bf16.mxu0 %v896_v4  ;;  %v904_v12 = vld [vmem:[%s1194_s1 + $0x58] sm:$0xff]   ;;  %v908_v16 = vld [vmem:[%s1194_s1 + $0x60] sm:$0xff]   ;;  %v912_v20 = vld [vmem:[%s1194_s1 + $0x68] sm:$0xff]  }
   0x6   :  { %828 = vmatprep.subr.bf16.mxu1 %v897_v5  ;;  %v905_v13 = vld [vmem:[%s1194_s1 + $0xd8] sm:$0xff]   ;;  %v909_v17 = vld [vmem:[%s1194_s1 + $0xe0] sm:$0xff]   ;;  %v913_v21 = vld [vmem:[%s1194_s1 + $0xe8] sm:$0xff]  }
   0x7   :  { %v906_v14 = vld [vmem:[%s1194_s1 + $0x18] sm:$0xff]   ;;  %v910_v18 = vld [vmem:[%s1194_s1 + $0x20] sm:$0xff]   ;;  %v914_v22 = vld [vmem:[%s1194_s1 + $0x28] sm:$0xff]  }
   0x8   :  { %807 = vmatpush3.bf16.msra.mxu0 %v898_v6  ;;  %v907_v15 = vld [vmem:[%s1194_s1 + $0x98] sm:$0xff]   ;;  %v911_v19 = vld [vmem:[%s1194_s1 + $0xa0] sm:$0xff]   ;;  %v915_v23 = vld [vmem:[%s1194_s1 + $0xa8] sm:$0xff]  }
   0x9   :  { %829 = vmatpush3.bf16.msra.mxu1 %v899_v7  ;;  %808 = vmatprep.subr.bf16.mxu0 %v900_v8  ;;  %v916_v24 = vld [vmem:[%s1194_s1 + $0x70] sm:$0xff]   ;;  %v920_v28 = vld [vmem:[%s1194_s1 + $0x78] sm:$0xff]   ;;  %v15_v32 = vld [vmem:[%s1195_s0] sm:$0xff] }
   0xa   :  { %830 = vmatprep.subr.bf16.mxu1 %v901_v9  ;;  %v917_v25 = vld [vmem:[%s1194_s1 + $0xf0] sm:$0xff]   ;;  %v921_v29 = vld [vmem:[%s1194_s1 + $0xf8] sm:$0xff]   ;;  %v16_v33 = vld [vmem:[%s1195_s0 + $0x8] sm:$0xff]  ;;  %v732_v34 = vcombine.low %v15_v32, %v15_v32  ;;  %v733_v35 = vcombine.high %v15_v32, %v15_v32 }
   0xb   :  { %v918_v26 = vld [vmem:[%s1194_s1 + $0x30] sm:$0xff]   ;;  %v922_v30 = vld [vmem:[%s1194_s1 + $0x38] sm:$0xff]   ;;  %v734_v36 = vcombine.low %v16_v33, %v16_v33  ;;  %v735_v37 = vcombine.high %v16_v33, %v16_v33  ;;  %v928_v38 = vld [vmem:[%s1194_s1 + $0x140] sm:$0xff]  }
   0xc   :  { %809 = vmatpush3.bf16.msra.mxu0 %v902_v10  ;;  %v919_v27 = vld [vmem:[%s1194_s1 + $0xb0] sm:$0xff]   ;;  %v923_v31 = vld [vmem:[%s1194_s1 + $0xb8] sm:$0xff]   ;;  %v929_v39 = vld [vmem:[%s1194_s1 + $0x1c0] sm:$0xff]   ;;  %598 = vmatprep.mubr.bf16.mxu0 %v733_v35 }
   0xd   :  { %831 = vmatpush3.bf16.msra.mxu1 %v903_v11  ;;  %810 = vmatprep.subr.bf16.mxu0 %v904_v12  ;;  %v930_v40 = vld [vmem:[%s1194_s1 + $0x100] sm:$0xff]   ;;  %v932_v42 = vld [vmem:[%s1194_s1 + $0x148] sm:$0xff]   ;;  %v936_v46 = vld [vmem:[%s1194_s1 + $0x150] sm:$0xff]  }
   0xe   :  { %832 = vmatprep.subr.bf16.mxu1 %v905_v13  ;;  %638 = vmatprep.mubr.bf16.mxu1 %v735_v37  ;;  %v931_v41 = vld [vmem:[%s1194_s1 + $0x180] sm:$0xff]   ;;  %v933_v43 = vld [vmem:[%s1194_s1 + $0x1c8] sm:$0xff]   ;;  %v937_v47 = vld [vmem:[%s1194_s1 + $0x1d0] sm:$0xff]  }
   0xf   :  { %v934_v44 = vld [vmem:[%s1194_s1 + $0x108] sm:$0xff]   ;;  %v938_v48 = vld [vmem:[%s1194_s1 + $0x110] sm:$0xff]   ;;  %v940_v50 = vld [vmem:[%s1194_s1 + $0x158] sm:$0xff]  }
  0x10   :  { %811 = vmatpush3.bf16.msra.mxu0 %v906_v14  ;;  %v935_v45 = vld [vmem:[%s1194_s1 + $0x188] sm:$0xff]   ;;  %v939_v49 = vld [vmem:[%s1194_s1 + $0x190] sm:$0xff]   ;;  %v941_v51 = vld [vmem:[%s1194_s1 + $0x1d8] sm:$0xff]  }
  0x11   :  { %833 = vmatpush3.bf16.msra.mxu1 %v907_v15  ;;  %812 = vmatprep.subr.bf16.mxu0 %v908_v16  ;;  %v942_v52 = vld [vmem:[%s1194_s1 + $0x118] sm:$0xff]   ;;  %v944_v54 = vld [vmem:[%s1194_s1 + $0x160] sm:$0xff]   ;;  %v948_v58 = vld [vmem:[%s1194_s1 + $0x168] sm:$0xff]  }
  0x12   :  { %834 = vmatprep.subr.bf16.mxu1 %v909_v17  ;;  %v943_v53 = vld [vmem:[%s1194_s1 + $0x198] sm:$0xff]   ;;  %v945_v55 = vld [vmem:[%s1194_s1 + $0x1e0] sm:$0xff]   ;;  %v949_v59 = vld [vmem:[%s1194_s1 + $0x1e8] sm:$0xff]  }
  0x13   :  { %v946_v56 = vld [vmem:[%s1194_s1 + $0x120] sm:$0xff]   ;;  %v950_v60 = vld [vmem:[%s1194_s1 + $0x128] sm:$0xff]   ;;  %v952_v62 = vld [vmem:[%s1194_s1 + $0x170] sm:$0xff]  }
  0x14   :  { %813 = vmatpush3.bf16.msra.mxu0 %v910_v18  ;;  %v947_v57 = vld [vmem:[%s1194_s1 + $0x1a0] sm:$0xff]   ;;  %v951_v61 = vld [vmem:[%s1194_s1 + $0x1a8] sm:$0xff]   ;;  %v953_v63 = vld [vmem:[%s1194_s1 + $0x1f0] sm:$0xff]  }
  0x15   :  { %835 = vmatpush3.bf16.msra.mxu1 %v911_v19  ;;  %814 = vmatprep.subr.bf16.mxu0 %v912_v20  ;;  %v954_v0 = vld [vmem:[%s1194_s1 + $0x130] sm:$0xff]   ;;  %v956_v2 = vld [vmem:[%s1194_s1 + $0x178] sm:$0xff]   ;;  %v731_v14 = vld [vmem:[%s1196_s2] ss:$0 sm:$0xff] }
  0x16   :  { %836 = vmatprep.subr.bf16.mxu1 %v913_v21  ;;  %v955_v1 = vld [vmem:[%s1194_s1 + $0x1b0] sm:$0xff]   ;;  %v957_v3 = vld [vmem:[%s1194_s1 + $0x1f8] sm:$0xff]  }
  0x17   :  { %v958_v4 = vld [vmem:[%s1194_s1 + $0x138] sm:$0xff]   ;;  %v17_v6 = vld [vmem:[%s1195_s0 + $0x10] sm:$0xff] }
  0x18   :  { %815 = vmatpush3.bf16.msra.mxu0 %v914_v22  ;;  %v959_v5 = vld [vmem:[%s1194_s1 + $0x1b8] sm:$0xff]   ;;  %v736_v7 = vcombine.low %v17_v6, %v17_v6  ;;  %v737_v8 = vcombine.high %v17_v6, %v17_v6 }
  0x19   :  { %837 = vmatpush3.bf16.msra.mxu1 %v915_v23  ;;  %816 = vmatprep.subr.bf16.mxu0 %v916_v24  ;;  %v18_v9 = vld [vmem:[%s1195_s0 + $0x18] sm:$0xff] }
  0x1a   :  { %838 = vmatprep.subr.bf16.mxu1 %v917_v25  ;;  %v738_v10 = vcombine.low %v18_v9, %v18_v9  ;;  %v739_v11 = vcombine.high %v18_v9, %v18_v9 }
  0x1c   :  { %817 = vmatpush3.bf16.msra.mxu0 %v918_v26 }
  0x1d   :  { %839 = vmatpush3.bf16.msra.mxu1 %v919_v27  ;;  %818 = vmatprep.subr.bf16.mxu0 %v920_v28 }
  0x1e   :  { %840 = vmatprep.subr.bf16.mxu1 %v921_v29 }
  0x20   :  { %819 = vmatpush3.bf16.msra.mxu0 %v922_v30 }
  0x21   :  { %841 = vmatpush3.bf16.msra.mxu1 %v923_v31  ;;  %848 = vmatprep.subr.bf16.mxu0 %v928_v38 }
  0x22   :  { %870 = vmatprep.subr.bf16.mxu1 %v929_v39 }
  0x23   :  { %599 = vmatmul.mubr.bf16.vlgmr.msra.gmra.mrb[0].mxu0 %v732_v34 }
  0x24   :  { %639 = vmatmul.mubr.bf16.vlgmr.msra.gmra.mrb[0].mxu1 %v734_v36  ;;  %849 = vmatpush3.bf16.msra.mxu0 %v930_v40 }
  0x25   :  { %871 = vmatpush3.bf16.msra.mxu1 %v931_v41  ;;  %850 = vmatprep.subr.bf16.mxu0 %v932_v42 }
  0x26   :  { %872 = vmatprep.subr.bf16.mxu1 %v933_v43  ;;  %678 = vmatprep.mubr.bf16.mxu0 %v737_v8 }
  0x27   :  { %718 = vmatprep.mubr.bf16.mxu1 %v739_v11 }
  0x28   :  { %851 = vmatpush3.bf16.msra.mxu0 %v934_v44 }
  0x29   :  { %873 = vmatpush3.bf16.msra.mxu1 %v935_v45  ;;  %852 = vmatprep.subr.bf16.mxu0 %v936_v46 }
  0x2a   :  { %874 = vmatprep.subr.bf16.mxu1 %v937_v47 }
  0x2c   :  { %853 = vmatpush3.bf16.msra.mxu0 %v938_v48 }
  0x2d   :  { %875 = vmatpush3.bf16.msra.mxu1 %v939_v49  ;;  %854 = vmatprep.subr.bf16.mxu0 %v940_v50 }
  0x2e   :  { %876 = vmatprep.subr.bf16.mxu1 %v941_v51 }
  0x30   :  { %855 = vmatpush3.bf16.msra.mxu0 %v942_v52 }
  0x31   :  { %877 = vmatpush3.bf16.msra.mxu1 %v943_v53  ;;  %856 = vmatprep.subr.bf16.mxu0 %v944_v54 }
  0x32   :  { %878 = vmatprep.subr.bf16.mxu1 %v945_v55 }
  0x34   :  { %857 = vmatpush3.bf16.msra.mxu0 %v946_v56 }
  0x35   :  { %879 = vmatpush3.bf16.msra.mxu1 %v947_v57  ;;  %858 = vmatprep.subr.bf16.mxu0 %v948_v58 }
  0x36   :  { %880 = vmatprep.subr.bf16.mxu1 %v949_v59 }
  0x38   :  { %859 = vmatpush3.bf16.msra.mxu0 %v950_v60 }
  0x39   :  { %881 = vmatpush3.bf16.msra.mxu1 %v951_v61  ;;  %860 = vmatprep.subr.bf16.mxu0 %v952_v62 }
  0x3a   :  { %882 = vmatprep.subr.bf16.mxu1 %v953_v63 }
  0x3c   :  { %861 = vmatpush3.bf16.msra.mxu0 %v954_v0 }
  0x3d   :  { %883 = vmatpush3.bf16.msra.mxu1 %v955_v1  ;;  %862 = vmatprep.subr.bf16.mxu0 %v956_v2 }
  0x3e   :  { %884 = vmatprep.subr.bf16.mxu1 %v957_v3 }
  0x40   :  { %863 = vmatpush3.bf16.msra.mxu0 %v958_v4 }
  0x41   :  { %885 = vmatpush3.bf16.msra.mxu1 %v959_v5 }
  0x43   :  { %679 = vmatmul.mubr.bf16.vlgmr.msra.gmra.mrb[4].mxu0 %v736_v7 }
  0x44   :  { %719 = vmatmul.mubr.bf16.vlgmr.msra.gmra.mrb[4].mxu1 %v738_v10 }
  0xf6   :  { %v820_v12 = vpop.f32.mrb[0].mxu0 }
  0xf7   :  { %v842_v13 = vpop.f32.mrb[0].mxu1  ;;  %v821_v15 = vpop.f32.mrb[1].mxu0 }
  0xf8   :  { %v843_v16 = vpop.f32.mrb[1].mxu1  ;;  %v822_v17 = vadd.f32 %v821_v15, %v820_v12  ;;  %v823_v19 = vpop.f32.mrb[2].mxu0 }
  0xf9   :  { %v844_v18 = vadd.f32 %v843_v16, %v842_v13  ;;  %v845_v20 = vpop.f32.mrb[2].mxu1  ;;  %v824_v21 = vpop.f32.mrb[3].mxu0 }
  0xfa   :  { %v846_v22 = vpop.f32.mrb[3].mxu1  ;;  %v601_v23 = vadd.f32 %v822_v17, %v731_v14 }
  0xfc   :  { %v641_v24 = vadd.f32 %v844_v18, %v601_v23 }
 0x116   :  { %v864_v25 = vpop.f32.mrb[4].mxu0 }
 0x117   :  { %v886_v26 = vpop.f32.mrb[4].mxu1  ;;  %v865_v27 = vpop.f32.mrb[5].mxu0 }
 0x118   :  { %v887_v28 = vpop.f32.mrb[5].mxu1  ;;  %v866_v29 = vadd.f32 %v865_v27, %v864_v25  ;;  %v867_v31 = vpop.f32.mrb[6].mxu0 }
 0x119   :  { %v888_v30 = vadd.f32 %v887_v28, %v886_v26  ;;  %v889_v32 = vpop.f32.mrb[6].mxu1  ;;  %v868_v33 = vpop.f32.mrb[7].mxu0 }
 0x11a   :  { %v890_v34 = vpop.f32.mrb[7].mxu1  ;;  %v681_v35 = vadd.f32 %v866_v29, %v641_v24 }
 0x11c   :  { %v721_v36 = vadd.f32 %v888_v30, %v681_v35 }
 0x11e   :  { %726 = vst [vmem:[%s1197_s3] sm:$0xff] %v721_v36 }

</bundles_post_ra>
